<compile_context>
chip_gen: v5e
topology: v5e:2x2
jax: 0.10.0
libtpu: 0.0.40
codegen_flags: <defaults>
</compile_context>

<pallas_src>
import functools

import jax
import jax.numpy as jnp
from jax.experimental import pallas as pl
from jax.experimental.pallas import tpu as pltpu

_VMEM_LIMIT = 32 * 1024 * 1024   # explicit scoped-VMEM limit (v5e default is only 16 MiB)


def _params(semantics):
    return pltpu.CompilerParams(dimension_semantics=semantics,
                                vmem_limit_bytes=_VMEM_LIMIT)


# ----------------------------------------------------------------------------
# Tiling helpers
# ----------------------------------------------------------------------------
def _tile_1d(n, max_tile):
    """Largest power-of-two multiple of 8 dividing n (<= max_tile); else n (full dim)."""
    if n % 8 == 0:
        t = 8
        while t * 2 <= max_tile and n % (t * 2) == 0:
            t *= 2
        return t
    return n


def _lane_tile(n, max_tile=2048):
    if n % 128 == 0:
        t = 128
        while t * 2 <= max_tile and n % (t * 2) == 0:
            t *= 2
        return t
    return n


def _row_plan(P, max_tile=512):
    """(padded_rows, row_tile): prefer a divisor tile; else pad rows (never one huge block)."""
    if P % 8 == 0:
        return P, _tile_1d(P, max_tile)
    t = min(max_tile, 256)
    return pl.cdiv(P, t) * t, t


def _pad_rows(a, p_pad):
    if a.shape[0] == p_pad:
        return a
    pad = [(0, p_pad - a.shape[0])] + [(0, 0)] * (a.ndim - 1)
    return jnp.pad(a, pad)


# ----------------------------------------------------------------------------
# Pallas kernels
# ----------------------------------------------------------------------------
def _pw_conv_kernel(x_ref, w_ref, scale_ref, bias_ref, o_ref, *, act):
    """Row tile of a 1x1 conv with folded BN: y = act(x @ w * scale + bias)."""
    y = jnp.dot(x_ref[...], w_ref[...], preferred_element_type=jnp.float32)
    y = y * scale_ref[...] + bias_ref[...]
    if act == "relu":
        y = jnp.maximum(y, 0.0)
    elif act == "sigmoid":
        y = jax.nn.sigmoid(y)
    o_ref[...] = y.astype(o_ref.dtype)


def _cbr_gate_kernel(x_ref, w_ref, scale_ref, bias_ref, s_ref, o_ref):
    """Fused LRASPP branch: relu(conv1x1 + folded BN) * per-batch sigmoid gate."""
    y = jnp.dot(x_ref[0], w_ref[...], preferred_element_type=jnp.float32)
    y = jnp.maximum(y * scale_ref[...] + bias_ref[...], 0.0)
    o_ref[0] = (y * s_ref[0]).astype(o_ref.dtype)


def _gap_kernel(x_ref, o_ref, *, inv_hw):
    """Tiled AdaptiveAvgPool2d(1): accumulate block partial means into the output."""
    @pl.when(pl.program_id(1) == 0)
    def _():
        o_ref[...] = jnp.zeros_like(o_ref)
    o_ref[...] += jnp.sum(x_ref[...].astype(jnp.float32), axis=1, keepdims=True) * inv_hw


def _classifier_kernel(low_ref, up_ref, wl_ref, wh_ref, bias_ref, o_ref):
    """Fused classifier: low_classifier(low) + high_classifier(up) + (b_low + b_high)."""
    y = jnp.dot(low_ref[...], wl_ref[...], preferred_element_type=jnp.float32)
    y = y + jnp.dot(up_ref[...], wh_ref[...], preferred_element_type=jnp.float32)
    o_ref[...] = (y + bias_ref[...]).astype(o_ref.dtype)


def _rmatmul_kernel(x_ref, m_ref, o_ref):
    """Row-tiled right matmul: o = x @ m (lane axis = columns of m)."""
    o_ref[...] = jnp.dot(x_ref[...].astype(jnp.float32), m_ref[...],
                         preferred_element_type=jnp.float32).astype(o_ref.dtype)


def _lmatmul_kernel(m_ref, x_ref, o_ref):
    """Shared left matrix against each batch slab: o[b] = m @ x[b]."""
    o_ref[0] = jnp.dot(m_ref[...], x_ref[0].astype(jnp.float32),
                       preferred_element_type=jnp.float32).astype(o_ref.dtype)


# ----------------------------------------------------------------------------
# Pallas wrappers
# ----------------------------------------------------------------------------
def pw_conv(x2d, w, scale, bias, act="none", out_dtype=jnp.float32):
    P, Cin = x2d.shape
    Cout = w.shape[1]
    P_pad, TP = _row_plan(P)
    xp = _pad_rows(x2d, P_pad)
    out = pl.pallas_call(
        functools.partial(_pw_conv_kernel, act=act),
        out_shape=jax.ShapeDtypeStruct((P_pad, Cout), out_dtype),
        grid=(P_pad // TP,),
        in_specs=[
            pl.BlockSpec((TP, Cin), lambda i: (i, 0)),
            pl.BlockSpec((Cin, Cout), lambda i: (0, 0)),
            pl.BlockSpec((1, Cout), lambda i: (0, 0)),
            pl.BlockSpec((1, Cout), lambda i: (0, 0)),
        ],
        out_specs=pl.BlockSpec((TP, Cout), lambda i: (i, 0)),
        compiler_params=_params(("parallel",)),
    )(xp, w, scale.reshape(1, Cout), bias.reshape(1, Cout))
    return out[:P]


def cbr_gate(x3d, w, scale, bias, s, out_dtype=jnp.bfloat16):
    """x3d: [N, HW, Cin] (bf16), s: [N, Cout] (f32) -> relu(x@w*scale+bias) * s."""
    N, HW, Cin = x3d.shape
    Cout = w.shape[1]
    THW = _tile_1d(HW, 2048)
    return pl.pallas_call(
        _cbr_gate_kernel,
        out_shape=jax.ShapeDtypeStruct((N, HW, Cout), out_dtype),
        grid=(N, HW // THW),
        in_specs=[
            pl.BlockSpec((1, THW, Cin), lambda n, t: (n, t, 0)),
            pl.BlockSpec((Cin, Cout), lambda n, t: (0, 0)),
            pl.BlockSpec((1, Cout), lambda n, t: (0, 0)),
            pl.BlockSpec((1, Cout), lambda n, t: (0, 0)),
            pl.BlockSpec((1, 1, Cout), lambda n, t: (n, 0, 0)),
        ],
        out_specs=pl.BlockSpec((1, THW, Cout), lambda n, t: (n, t, 0)),
        compiler_params=_params(("parallel", "parallel")),
    )(x3d, w, scale.reshape(1, Cout), bias.reshape(1, Cout), s.reshape(N, 1, Cout))


def global_avg_pool(x3d):
    """x3d: [N, HW, C] -> [N, C] f32, spatially tiled with an accumulator output."""
    N, HW, C = x3d.shape
    THW = _tile_1d(HW, 2048)
    out = pl.pallas_call(
        functools.partial(_gap_kernel, inv_hw=1.0 / HW),
        out_shape=jax.ShapeDtypeStruct((N, 1, C), jnp.float32),
        grid=(N, HW // THW),
        in_specs=[pl.BlockSpec((1, THW, C), lambda n, t: (n, t, 0))],
        out_specs=pl.BlockSpec((1, 1, C), lambda n, t: (n, 0, 0)),
        compiler_params=_params(("parallel", "arbitrary")),
    )(x3d)
    return out[:, 0, :]


def classifier_fused(low2d, up2d, w_low, w_high, bias, out_dtype=jnp.float32):
    P, K1 = low2d.shape
    K2 = up2d.shape[1]
    nc = w_low.shape[1]
    P_pad, TP = _row_plan(P)
    lowp = _pad_rows(low2d, P_pad)
    upp = _pad_rows(up2d, P_pad)
    out = pl.pallas_call(
        _classifier_kernel,
        out_shape=jax.ShapeDtypeStruct((P_pad, nc), out_dtype),
        grid=(P_pad // TP,),
        in_specs=[
            pl.BlockSpec((TP, K1), lambda i: (i, 0)),
            pl.BlockSpec((TP, K2), lambda i: (i, 0)),
            pl.BlockSpec((K1, nc), lambda i: (0, 0)),
            pl.BlockSpec((K2, nc), lambda i: (0, 0)),
            pl.BlockSpec((1, nc), lambda i: (0, 0)),
        ],
        out_specs=pl.BlockSpec((TP, nc), lambda i: (i, 0)),
        compiler_params=_params(("parallel",)),
    )(lowp, upp, w_low, w_high, bias.reshape(1, nc))
    return out[:P]


def rmatmul(x2d, m, out_dtype=jnp.float32):
    """x2d: [P, K] @ m: [K, L] -> [P, L], row-tiled, lane axis = L (lane-dense stores)."""
    P, K = x2d.shape
    L = m.shape[1]
    P_pad, TP = _row_plan(P)
    xp = _pad_rows(x2d, P_pad)
    out = pl.pallas_call(
        _rmatmul_kernel,
        out_shape=jax.ShapeDtypeStruct((P_pad, L), out_dtype),
        grid=(P_pad // TP,),
        in_specs=[pl.BlockSpec((TP, K), lambda i: (i, 0)),
                  pl.BlockSpec((K, L), lambda i: (0, 0))],
        out_specs=pl.BlockSpec((TP, L), lambda i: (i, 0)),
        compiler_params=_params(("parallel",)),
    )(xp, m.astype(jnp.float32))
    return out[:P]


def lmatmul(m, x3d, out_dtype=jnp.float32):
    """m: [Mo, K]; x3d: [B, K, L] -> [B, Mo, L]; the lane axis L is tiled."""
    B, K, L = x3d.shape
    Mo = m.shape[0]
    TL = _lane_tile(L)
    return pl.pallas_call(
        _lmatmul_kernel,
        out_shape=jax.ShapeDtypeStruct((B, Mo, L), out_dtype),
        grid=(B, L // TL),
        in_specs=[pl.BlockSpec((Mo, K), lambda b, l: (0, 0)),
                  pl.BlockSpec((1, K, TL), lambda b, l: (b, 0, l))],
        out_specs=pl.BlockSpec((1, Mo, TL), lambda b, l: (b, 0, l)),
        compiler_params=_params(("parallel", "parallel")),
    )(m.astype(jnp.float32), x3d)


# ----------------------------------------------------------------------------
# Bilinear interpolation (align_corners=False) as matmuls
# ----------------------------------------------------------------------------
def _interp_matrix(out_size, in_size):
    if in_size == out_size:
        return jnp.eye(out_size, dtype=jnp.float32)
    scale = in_size / out_size
    src = (jnp.arange(out_size, dtype=jnp.float32) + 0.5) * scale - 0.5
    src = jnp.clip(src, 0.0, in_size - 1.0)
    i0 = jnp.clip(jnp.floor(src).astype(jnp.int32), 0, in_size - 1)
    i1 = jnp.minimum(i0 + 1, in_size - 1)
    w1 = src - i0.astype(jnp.float32)
    w0 = 1.0 - w1
    rows = jnp.arange(out_size)
    mat = jnp.zeros((out_size, in_size), dtype=jnp.float32)
    mat = mat.at[rows, i0].add(w0)
    mat = mat.at[rows, i1].add(w1)
    return mat


def resize_nhwc(x, Ho, Wo, out_dtype=jnp.float32):
    """Bilinear resize of [N, Hi, Wi, C] (channels on lanes); width pass first."""
    N, Hi, Wi, C = x.shape
    if Hi == Ho and Wi == Wo:
        return x.astype(out_dtype)              # identity resize short-circuit
    y = x
    if Wi != Wo:
        Rw = _interp_matrix(Wo, Wi)                           # [Wo, Wi]
        y = lmatmul(Rw, y.reshape(N * Hi, Wi, C))             # [N*Hi, Wo, C]
        y = y.reshape(N, Hi, Wo, C)
    if Hi != Ho:
        Rh = _interp_matrix(Ho, Hi)                           # [Ho, Hi]
        y = lmatmul(Rh, y.reshape(N, Hi, Wo * C))             # [N, Ho, Wo*C]
        y = y.reshape(N, Ho, Wo, C)
    return y.astype(out_dtype)


def resize_to_nchw(x_nhwc, Ho, Wo):
    """Final bilinear upsample produced directly in NCHW (lane axis = output W)."""
    N, Hi, Wi, C = x_nhwc.shape
    x = jnp.transpose(x_nhwc, (0, 3, 1, 2))     # tiny (low-res) tensor transpose in XLA
    if Hi == Ho and Wi == Wo:
        return x.astype(jnp.float32)
    y = x.reshape(N * C, Hi, Wi)
    if Wi != Wo:
        RwT = _interp_matrix(Wo, Wi).T                        # [Wi, Wo]
        y = rmatmul(y.reshape(N * C * Hi, Wi), RwT)           # [N*C*Hi, Wo] (lane-dense)
        y = y.reshape(N * C, Hi, Wo)
    if Hi != Ho:
        Rh = _interp_matrix(Ho, Hi)                           # [Ho, Hi]
        y = lmatmul(Rh, y)                                    # [N*C, Ho, Wo]
    return y.reshape(N, C, Ho, Wo)


# ----------------------------------------------------------------------------
# Glue / parameters
# ----------------------------------------------------------------------------
def avg_pool_nhwc(x, k):
    N, H, W, C = x.shape
    return x.reshape(N, H // k, k, W // k, k, C).mean(axis=(2, 4))


def init_params(key, num_classes, in_ch=3):
    ks = jax.random.split(key, 11)

    def conv_w(k, cin, cout, std=0.05):
        return std * jax.random.normal(k, (cin, cout), jnp.float32)

    def bn_fold(k, c, eps=1e-5):
        k1, k2, k3, k4 = jax.random.split(k, 4)
        gamma = 1.0 + 0.1 * jax.random.normal(k1, (c,), jnp.float32)
        beta = 0.1 * jax.random.normal(k2, (c,), jnp.float32)
        mean = 0.1 * jax.random.normal(k3, (c,), jnp.float32)
        var = 1.0 + 0.1 * jnp.abs(jax.random.normal(k4, (c,), jnp.float32))
        scale = gamma / jnp.sqrt(var + eps)
        bias = beta - mean * scale
        return scale, bias

    p = {}
    p["bb1_w"] = conv_w(ks[0], in_ch, 512)
    p["bb1_scale"], p["bb1_bias"] = bn_fold(ks[1], 512)
    p["bb2_w"] = conv_w(ks[2], 512, 512)
    p["bb2_scale"], p["bb2_bias"] = bn_fold(ks[3], 512)
    p["cbr_w"] = conv_w(ks[4], 512, 128)
    p["cbr_scale"], p["cbr_bias"] = bn_fold(ks[5], 128)
    p["scale_w"] = conv_w(ks[6], 512, 128)                    # bias=False in torchvision
    p["lowc_w"] = conv_w(ks[7], 512, num_classes)
    p["lowc_b"] = 0.05 * jax.random.normal(ks[8], (num_classes,), jnp.float32)
    p["highc_w"] = conv_w(ks[9], 128, num_classes)
    p["highc_b"] = 0.05 * jax.random.normal(ks[10], (num_classes,), jnp.float32)
    return p


# ----------------------------------------------------------------------------
# Forward pass (use_pallas=True -> Pallas kernels; False -> pure-JAX reference
# with identical bf16 quantization points so results can be compared tightly)
# ----------------------------------------------------------------------------
def _ref_resize(x, Ho, Wo):
    N, Hi, Wi, C = x.shape

    def coords(o, i):
        src = jnp.clip((jnp.arange(o, dtype=jnp.float32) + 0.5) * (i / o) - 0.5,
                       0.0, i - 1.0)
        i0 = jnp.clip(jnp.floor(src).astype(jnp.int32), 0, i - 1)
        i1 = jnp.minimum(i0 + 1, i - 1)
        lam = src - i0.astype(jnp.float32)
        return i0, i1, lam

    h0, h1, lh = coords(Ho, Hi)
    w0, w1, lw = coords(Wo, Wi)
    xh = (x[:, h0] * (1.0 - lh)[None, :, None, None]
          + x[:, h1] * lh[None, :, None, None])
    y = (xh[:, :, w0] * (1.0 - lw)[None, None, :, None]
         + xh[:, :, w1] * lw[None, None, :, None])
    return y


def forward(x_nchw, params, num_classes, use_pallas=True):
    f32, bf16 = jnp.float32, jnp.bfloat16
    N, Cin, H, W = x_nchw.shape
    x = jnp.transpose(x_nchw, (0, 2, 3, 1)).astype(f32)       # NHWC

    # ---- synthetic backbone stage 1 ('low', stride 4, 512 ch).  Cin=3 conv is
    #      left to XLA: K=3 uses 3/128 MXU lanes, a pallas_call is pure overhead.
    xl = avg_pool_nhwc(x, 4)
    Hl, Wl = xl.shape[1], xl.shape[2]
    low = jnp.maximum((xl.reshape(-1, Cin) @ params["bb1_w"]) * params["bb1_scale"]
                      + params["bb1_bias"], 0.0)
    low = low.astype(bf16)                                    # [N*Hl*Wl, 512]

    # ---- stage 2 ('high', stride 8, 512 ch): Pallas 1x1 conv + BN + ReLU (bf16 MXU)
    xh = avg_pool_nhwc(low.astype(f32).reshape(N, Hl, Wl, 512), 2)
    Hh, Wh = xh.shape[1], xh.shape[2]
    xh2d = xh.reshape(-1, 512).astype(bf16)
    bb2_w = params["bb2_w"].astype(bf16)
    if use_pallas:
        high2d = pw_conv(xh2d, bb2_w, params["bb2_scale"], params["bb2_bias"],
                         act="relu", out_dtype=bf16)
    else:
        y = jnp.dot(xh2d, bb2_w, preferred_element_type=f32)
        high2d = jnp.maximum(y * params["bb2_scale"] + params["bb2_bias"], 0.0).astype(bf16)
    high = high2d.reshape(N, Hh * Wh, 512)                    # [N, HWh, 512] bf16

    # ---- LRASPP head: scale branch (GAP -> 1x1 conv (bias=False) -> sigmoid).  The
    #      N-row matmul is tiny, so it stays in XLA; GAP is a tiled Pallas reduction.
    if use_pallas:
        pooled = global_avg_pool(high)                        # [N, 512] f32
    else:
        pooled = high.astype(f32).mean(axis=1)
    s = jax.nn.sigmoid(pooled @ params["scale_w"])            # [N, 128] f32

    # ---- fused cbr conv + BN + ReLU + channel gate (no HBM round trip for the gate)
    cbr_w = params["cbr_w"].astype(bf16)
    if use_pallas:
        gated = cbr_gate(high, cbr_w, params["cbr_scale"], params["cbr_bias"], s,
                         out_dtype=bf16)
    else:
        y = jnp.dot(high, cbr_w, preferred_element_type=f32)
        y = jnp.maximum(y * params["cbr_scale"] + params["cbr_bias"], 0.0)
        gated = (y * s[:, None, :]).astype(bf16)
    gated = gated.reshape(N, Hh, Wh, 128)

    # ---- upsample gated branch to 'low' resolution (bilinear, align_corners=False)
    if use_pallas:
        up = resize_nhwc(gated, Hl, Wl, out_dtype=bf16)
    else:
        up = _ref_resize(gated.astype(f32), Hl, Wl).astype(bf16)
    up2d = up.reshape(-1, 128)

    # ---- fused classifier: low_classifier(low) + high_classifier(up) + bias (one kernel)
    lowc_w = params["lowc_w"].astype(bf16)
    highc_w = params["highc_w"].astype(bf16)
    cls_bias = params["lowc_b"] + params["highc_b"]
    if use_pallas:
        logits = classifier_fused(low, up2d, lowc_w, highc_w, cls_bias)
    else:
        logits = (jnp.dot(low, lowc_w, preferred_element_type=f32)
                  + jnp.dot(up2d, highc_w, preferred_element_type=f32) + cls_bias)
    logits = logits.reshape(N, Hl, Wl, num_classes)

    # ---- final F.interpolate to input resolution, emitted directly as NCHW
    if use_pallas:
        out = resize_to_nchw(logits, H, W)
    else:
        out = jnp.transpose(_ref_resize(logits, H, W), (0, 3, 1, 2))
    return {"out": out}


# ----------------------------------------------------------------------------
if __name__ == "__main__":
    key = jax.random.PRNGKey(0)
    k_x, k_p = jax.random.split(key)

    num_classes = 6
    x = jax.random.normal(k_x, (2, 3, 16, 16), jnp.float32)   # NCHW like PyTorch
    params = init_params(k_p, num_classes)

    fwd = jax.jit(functools.partial(forward, params=params, num_classes=num_classes,
                                    use_pallas=True))
    out = fwd(x)
    jax.block_until_ready(out)

    ref = jax.jit(functools.partial(forward, params=params, num_classes=num_classes,
                                    use_pallas=False))(x)
    jax.block_until_ready(ref)

    assert out["out"].shape == (2, num_classes, 16, 16)
    assert bool(jnp.all(jnp.isfinite(out["out"])))
    max_err = float(jnp.max(jnp.abs(out["out"] - ref["out"])))
    assert max_err < 3e-2, f"pallas vs reference mismatch: max_err={max_err}"
    print("KERNEL_OK")
</pallas_src>

<mosaic_0001>
module attributes {stable_mosaic.version = 11 : i64} {
  func.func @_pw_conv_kernel(%arg0: i32, %arg1: memref<8x512xbf16, #tpu.memory_space<vmem>>, %arg2: memref<512x512xbf16, #tpu.memory_space<vmem>>, %arg3: memref<1x512xf32, #tpu.memory_space<vmem>>, %arg4: memref<1x512xf32, #tpu.memory_space<vmem>>, %arg5: memref<8x512xbf16, #tpu.memory_space<vmem>>) attributes {dimension_semantics = [#tpu.dimension_semantics<parallel>], iteration_bounds = array<i64: 1>, scalar_prefetch = 0 : i64, scratch_operands = 0 : i64, tpu.core_type = #tpu.core_type<tc>, window_params = [{transform_indices = @transform_0, window_bounds = array<i64: 8, 512>}, {pipeline_mode = #tpu.pipeline_mode<synchronous>, transform_indices = @transform_1, window_bounds = array<i64: 512, 512>}, {pipeline_mode = #tpu.pipeline_mode<synchronous>, transform_indices = @transform_2, window_bounds = array<i64: 1, 512>}, {pipeline_mode = #tpu.pipeline_mode<synchronous>, transform_indices = @transform_3, window_bounds = array<i64: 1, 512>}, {transform_indices = @transform_4, window_bounds = array<i64: 8, 512>}]} {
    %c0 = arith.constant 0 : index
    %c0_0 = arith.constant 0 : index
    %0 = vector.load %arg1[%c0, %c0_0] : memref<8x512xbf16, #tpu.memory_space<vmem>>, vector<8x512xbf16>
    %c0_1 = arith.constant 0 : index
    %c0_2 = arith.constant 0 : index
    %1 = vector.load %arg2[%c0_1, %c0_2] : memref<512x512xbf16, #tpu.memory_space<vmem>>, vector<512x512xbf16>
    %cst = arith.constant dense<0.000000e+00> : vector<8x512xf32>
    %2 = tpu.matmul %0, %1, %cst {dimension_numbers = #tpu.dot_dimension_numbers<[1], [0], [0], [1], [0, 0, 1, 1], [], []>} : vector<8x512xbf16>, vector<512x512xbf16>, vector<8x512xf32> -> vector<8x512xf32>
    %c0_3 = arith.constant 0 : index
    %c0_4 = arith.constant 0 : index
    %3 = vector.load %arg3[%c0_3, %c0_4] : memref<1x512xf32, #tpu.memory_space<vmem>>, vector<1x512xf32>
    %4 = vector.broadcast %3 : vector<1x512xf32> to vector<8x512xf32>
    %5 = arith.mulf %2, %4 : vector<8x512xf32>
    %c0_5 = arith.constant 0 : index
    %c0_6 = arith.constant 0 : index
    %6 = vector.load %arg4[%c0_5, %c0_6] : memref<1x512xf32, #tpu.memory_space<vmem>>, vector<1x512xf32>
    %7 = vector.broadcast %6 : vector<1x512xf32> to vector<8x512xf32>
    %8 = arith.addf %5, %7 : vector<8x512xf32>
    %cst_7 = arith.constant 0.000000e+00 : f32
    %9 = vector.broadcast %cst_7 : f32 to vector<8x512xf32>
    %10 = arith.maximumf %8, %9 : vector<8x512xf32>
    %11 = arith.truncf %10 : vector<8x512xf32> to vector<8x512xbf16>
    %c0_8 = arith.constant 0 : index
    %c0_9 = arith.constant 0 : index
    %12 = vector.load %arg5[%c0_8, %c0_9] : memref<8x512xbf16, #tpu.memory_space<vmem>>, vector<8x512xbf16>
    tpu.vector_store %arg5[%c0_8, %c0_9], %11 {strides = array<i32>} : memref<8x512xbf16, #tpu.memory_space<vmem>>, vector<8x512xbf16>,
    return
  }
  func.func @transform_0(%arg0: i32) -> (i32, i32) {
    %c0_i32 = arith.constant 0 : i32
    %c0_i32_0 = arith.constant 0 : i32
    return %arg0, %c0_i32 : i32, i32
  }
  func.func @transform_1(%arg0: i32) -> (i32, i32) {
    %c0_i32 = arith.constant 0 : i32
    %c0_i32_0 = arith.constant 0 : i32
    %c0_i32_1 = arith.constant 0 : i32
    return %c0_i32, %c0_i32_0 : i32, i32
  }
  func.func @transform_2(%arg0: i32) -> (i32, i32) {
    %c0_i32 = arith.constant 0 : i32
    %c0_i32_0 = arith.constant 0 : i32
    %c0_i32_1 = arith.constant 0 : i32
    return %c0_i32, %c0_i32_0 : i32, i32
  }
  func.func @transform_3(%arg0: i32) -> (i32, i32) {
    %c0_i32 = arith.constant 0 : i32
    %c0_i32_0 = arith.constant 0 : i32
    %c0_i32_1 = arith.constant 0 : i32
    return %c0_i32, %c0_i32_0 : i32, i32
  }
  func.func @transform_4(%arg0: i32) -> (i32, i32) {
    %c0_i32 = arith.constant 0 : i32
    %c0_i32_0 = arith.constant 0 : i32
    return %arg0, %c0_i32 : i32, i32
  }
}

module attributes {stable_mosaic.version = 11 : i64} {
  func.func @_gap_kernel(%arg0: i32, %arg1: i32, %arg2: memref<1x4x512xbf16, #tpu.memory_space<vmem>>, %arg3: memref<1x1x512xf32, #tpu.memory_space<vmem>>) attributes {dimension_semantics = [#tpu.dimension_semantics<parallel>, #tpu.dimension_semantics<arbitrary>], iteration_bounds = array<i64: 2, 1>, scalar_prefetch = 0 : i64, scratch_operands = 0 : i64, tpu.core_type = #tpu.core_type<tc>, window_params = [{transform_indices = @transform_0, window_bounds = array<i64: 1, 4, 512>}, {transform_indices = @transform_1, window_bounds = array<i64: 1, 1, 512>}]} {
    %c0_i32 = arith.constant 0 : i32
    %0 = arith.cmpi eq, %arg1, %c0_i32 : i32
    %1 = arith.extui %0 : i1 to i32
    %c0_i32_0 = arith.constant 0 : i32
    %2 = arith.cmpi ne, %1, %c0_i32_0 : i32
    scf.if %2 {
      %cst_10 = arith.constant 0.000000e+00 : f32
      %12 = vector.broadcast %cst_10 : f32 to vector<1x1x512xf32>
      %c0_11 = arith.constant 0 : index
      %c0_12 = arith.constant 0 : index
      %c0_13 = arith.constant 0 : index
      %13 = vector.load %arg3[%c0_11, %c0_12, %c0_13] : memref<1x1x512xf32, #tpu.memory_space<vmem>>, vector<1x1x512xf32>
      tpu.vector_store %arg3[%c0_11, %c0_12, %c0_13], %12 {strides = array<i32>} : memref<1x1x512xf32, #tpu.memory_space<vmem>>, vector<1x1x512xf32>,
    } else {
    }
    %c0 = arith.constant 0 : index
    %c0_1 = arith.constant 0 : index
    %c0_2 = arith.constant 0 : index
    %3 = vector.load %arg3[%c0, %c0_1, %c0_2] : memref<1x1x512xf32, #tpu.memory_space<vmem>>, vector<1x1x512xf32>
    %c0_3 = arith.constant 0 : index
    %c0_4 = arith.constant 0 : index
    %c0_5 = arith.constant 0 : index
    %4 = vector.load %arg2[%c0_3, %c0_4, %c0_5] : memref<1x4x512xbf16, #tpu.memory_space<vmem>>, vector<1x4x512xbf16>
    %5 = arith.extf %4 : vector<1x4x512xbf16> to vector<1x4x512xf32>
    %cst = arith.constant dense<0.000000e+00> : vector<1x512xf32>
    %6 = vector.multi_reduction <add>, %5, %cst [1] : vector<1x4x512xf32> to vector<1x512xf32>
    %7 = vector.shape_cast %6 : vector<1x512xf32> to vector<1x1x512xf32>
    %cst_6 = arith.constant 2.500000e-01 : f32
    %8 = vector.broadcast %cst_6 : f32 to vector<1x1x512xf32>
    %9 = arith.mulf %7, %8 : vector<1x1x512xf32>
    %10 = arith.addf %3, %9 : vector<1x1x512xf32>
    %c0_7 = arith.constant 0 : index
    %c0_8 = arith.constant 0 : index
    %c0_9 = arith.constant 0 : index
    %11 = vector.load %arg3[%c0_7, %c0_8, %c0_9] : memref<1x1x512xf32, #tpu.memory_space<vmem>>, vector<1x1x512xf32>
    tpu.vector_store %arg3[%c0_7, %c0_8, %c0_9], %10 {strides = array<i32>} : memref<1x1x512xf32, #tpu.memory_space<vmem>>, vector<1x1x512xf32>,
    return
  }
  func.func @transform_0(%arg0: i32, %arg1: i32) -> (i32, i32, i32) {
    %c0_i32 = arith.constant 0 : i32
    %c0_i32_0 = arith.constant 0 : i32
    return %arg0, %arg1, %c0_i32 : i32, i32, i32
  }
  func.func @transform_1(%arg0: i32, %arg1: i32) -> (i32, i32, i32) {
    %c0_i32 = arith.constant 0 : i32
    %c0_i32_0 = arith.constant 0 : i32
    %c0_i32_1 = arith.constant 0 : i32
    return %arg0, %c0_i32, %c0_i32_0 : i32, i32, i32
  }
}

module attributes {stable_mosaic.version = 11 : i64} {
  func.func @_cbr_gate_kernel(%arg0: i32, %arg1: i32, %arg2: memref<1x4x512xbf16, #tpu.memory_space<vmem>>, %arg3: memref<512x128xbf16, #tpu.memory_space<vmem>>, %arg4: memref<1x128xf32, #tpu.memory_space<vmem>>, %arg5: memref<1x128xf32, #tpu.memory_space<vmem>>, %arg6: memref<1x1x128xf32, #tpu.memory_space<vmem>>, %arg7: memref<1x4x128xbf16, #tpu.memory_space<vmem>>) attributes {dimension_semantics = [#tpu.dimension_semantics<parallel>, #tpu.dimension_semantics<parallel>], iteration_bounds = array<i64: 2, 1>, scalar_prefetch = 0 : i64, scratch_operands = 0 : i64, tpu.core_type = #tpu.core_type<tc>, window_params = [{transform_indices = @transform_0, window_bounds = array<i64: 1, 4, 512>}, {pipeline_mode = #tpu.pipeline_mode<synchronous>, transform_indices = @transform_1, window_bounds = array<i64: 512, 128>}, {pipeline_mode = #tpu.pipeline_mode<synchronous>, transform_indices = @transform_2, window_bounds = array<i64: 1, 128>}, {pipeline_mode = #tpu.pipeline_mode<synchronous>, transform_indices = @transform_3, window_bounds = array<i64: 1, 128>}, {transform_indices = @transform_4, window_bounds = array<i64: 1, 1, 128>}, {transform_indices = @transform_5, window_bounds = array<i64: 1, 4, 128>}]} {
    %c0 = arith.constant 0 : index
    %c0_0 = arith.constant 0 : index
    %c0_1 = arith.constant 0 : index
    %0 = vector.load %arg2[%c0, %c0_0, %c0_1] : memref<1x4x512xbf16, #tpu.memory_space<vmem>>, vector<1x4x512xbf16>
    %1 = vector.shape_cast %0 : vector<1x4x512xbf16> to vector<4x512xbf16>
    %c0_2 = arith.constant 0 : index
    %c0_3 = arith.constant 0 : index
    %2 = vector.load %arg3[%c0_2, %c0_3] : memref<512x128xbf16, #tpu.memory_space<vmem>>, vector<512x128xbf16>
    %cst = arith.constant dense<0.000000e+00> : vector<4x128xf32>
    %3 = tpu.matmul %1, %2, %cst {dimension_numbers = #tpu.dot_dimension_numbers<[1], [0], [0], [1], [0, 0, 1, 1], [], []>} : vector<4x512xbf16>, vector<512x128xbf16>, vector<4x128xf32> -> vector<4x128xf32>
    %c0_4 = arith.constant 0 : index
    %c0_5 = arith.constant 0 : index
    %4 = vector.load %arg4[%c0_4, %c0_5] : memref<1x128xf32, #tpu.memory_space<vmem>>, vector<1x128xf32>
    %5 = vector.broadcast %4 : vector<1x128xf32> to vector<4x128xf32>
    %6 = arith.mulf %3, %5 : vector<4x128xf32>
    %c0_6 = arith.constant 0 : index
    %c0_7 = arith.constant 0 : index
    %7 = vector.load %arg5[%c0_6, %c0_7] : memref<1x128xf32, #tpu.memory_space<vmem>>, vector<1x128xf32>
    %8 = vector.broadcast %7 : vector<1x128xf32> to vector<4x128xf32>
    %9 = arith.addf %6, %8 : vector<4x128xf32>
    %cst_8 = arith.constant 0.000000e+00 : f32
    %10 = vector.broadcast %cst_8 : f32 to vector<4x128xf32>
    %11 = arith.maximumf %9, %10 : vector<4x128xf32>
    %c0_9 = arith.constant 0 : index
    %c0_10 = arith.constant 0 : index
    %c0_11 = arith.constant 0 : index
    %12 = vector.load %arg6[%c0_9, %c0_10, %c0_11] : memref<1x1x128xf32, #tpu.memory_space<vmem>>, vector<1x1x128xf32>
    %13 = vector.shape_cast %12 : vector<1x1x128xf32> to vector<1x128xf32>
    %14 = vector.broadcast %13 : vector<1x128xf32> to vector<4x128xf32>
    %15 = arith.mulf %11, %14 : vector<4x128xf32>
    %16 = arith.truncf %15 : vector<4x128xf32> to vector<4x128xbf16>
    %c0_12 = arith.constant 0 : index
    %c0_13 = arith.constant 0 : index
    %c0_14 = arith.constant 0 : index
    %17 = vector.load %arg7[%c0_12, %c0_13, %c0_14] : memref<1x4x128xbf16, #tpu.memory_space<vmem>>, vector<1x4x128xbf16>
    %18 = vector.shape_cast %17 : vector<1x4x128xbf16> to vector<4x128xbf16>
    %19 = vector.shape_cast %16 : vector<4x128xbf16> to vector<1x4x128xbf16>
    tpu.vector_store %arg7[%c0_12, %c0_13, %c0_14], %19 {strides = array<i32>} : memref<1x4x128xbf16, #tpu.memory_space<vmem>>, vector<1x4x128xbf16>,
    return
  }
  func.func @transform_0(%arg0: i32, %arg1: i32) -> (i32, i32, i32) {
    %c0_i32 = arith.constant 0 : i32
    %c0_i32_0 = arith.constant 0 : i32
    return %arg0, %arg1, %c0_i32 : i32, i32, i32
  }
  func.func @transform_1(%arg0: i32, %arg1: i32) -> (i32, i32) {
    %c0_i32 = arith.constant 0 : i32
    %c0_i32_0 = arith.constant 0 : i32
    %c0_i32_1 = arith.constant 0 : i32
    return %c0_i32, %c0_i32_0 : i32, i32
  }
  func.func @transform_2(%arg0: i32, %arg1: i32) -> (i32, i32) {
    %c0_i32 = arith.constant 0 : i32
    %c0_i32_0 = arith.constant 0 : i32
    %c0_i32_1 = arith.constant 0 : i32
    return %c0_i32, %c0_i32_0 : i32, i32
  }
  func.func @transform_3(%arg0: i32, %arg1: i32) -> (i32, i32) {
    %c0_i32 = arith.constant 0 : i32
    %c0_i32_0 = arith.constant 0 : i32
    %c0_i32_1 = arith.constant 0 : i32
    return %c0_i32, %c0_i32_0 : i32, i32
  }
  func.func @transform_4(%arg0: i32, %arg1: i32) -> (i32, i32, i32) {
    %c0_i32 = arith.constant 0 : i32
    %c0_i32_0 = arith.constant 0 : i32
    %c0_i32_1 = arith.constant 0 : i32
    return %arg0, %c0_i32, %c0_i32_0 : i32, i32, i32
  }
  func.func @transform_5(%arg0: i32, %arg1: i32) -> (i32, i32, i32) {
    %c0_i32 = arith.constant 0 : i32
    %c0_i32_0 = arith.constant 0 : i32
    return %arg0, %arg1, %c0_i32 : i32, i32, i32
  }
}

module attributes {stable_mosaic.version = 11 : i64} {
  func.func @_lmatmul_kernel(%arg0: i32, %arg1: i32, %arg2: memref<4x2xf32, #tpu.memory_space<vmem>>, %arg3: memref<1x2x512xf32, #tpu.memory_space<vmem>>, %arg4: memref<1x4x512xf32, #tpu.memory_space<vmem>>) attributes {dimension_semantics = [#tpu.dimension_semantics<parallel>, #tpu.dimension_semantics<parallel>], iteration_bounds = array<i64: 2, 1>, scalar_prefetch = 0 : i64, scratch_operands = 0 : i64, tpu.core_type = #tpu.core_type<tc>, window_params = [{pipeline_mode = #tpu.pipeline_mode<synchronous>, transform_indices = @transform_0, window_bounds = array<i64: 4, 2>}, {transform_indices = @transform_1, window_bounds = array<i64: 1, 2, 512>}, {transform_indices = @transform_2, window_bounds = array<i64: 1, 4, 512>}]} {
    %c0 = arith.constant 0 : index
    %c0_0 = arith.constant 0 : index
    %0 = vector.load %arg2[%c0, %c0_0] : memref<4x2xf32, #tpu.memory_space<vmem>>, vector<4x2xf32>
    %c0_1 = arith.constant 0 : index
    %c0_2 = arith.constant 0 : index
    %c0_3 = arith.constant 0 : index
    %1 = vector.load %arg3[%c0_1, %c0_2, %c0_3] : memref<1x2x512xf32, #tpu.memory_space<vmem>>, vector<1x2x512xf32>
    %2 = vector.shape_cast %1 : vector<1x2x512xf32> to vector<2x512xf32>
    %cst = arith.constant dense<0.000000e+00> : vector<4x512xf32>
    %3 = tpu.matmul %0, %2, %cst {dimension_numbers = #tpu.dot_dimension_numbers<[1], [0], [0], [1], [0, 0, 1, 1], [], []>} : vector<4x2xf32>, vector<2x512xf32>, vector<4x512xf32> -> vector<4x512xf32>
    %c0_4 = arith.constant 0 : index
    %c0_5 = arith.constant 0 : index
    %c0_6 = arith.constant 0 : index
    %4 = vector.load %arg4[%c0_4, %c0_5, %c0_6] : memref<1x4x512xf32, #tpu.memory_space<vmem>>, vector<1x4x512xf32>
    %5 = vector.shape_cast %4 : vector<1x4x512xf32> to vector<4x512xf32>
    %6 = vector.shape_cast %3 : vector<4x512xf32> to vector<1x4x512xf32>
    tpu.vector_store %arg4[%c0_4, %c0_5, %c0_6], %6 {strides = array<i32>} : memref<1x4x512xf32, #tpu.memory_space<vmem>>, vector<1x4x512xf32>,
    return
  }
  func.func @transform_0(%arg0: i32, %arg1: i32) -> (i32, i32) {
    %c0_i32 = arith.constant 0 : i32
    %c0_i32_0 = arith.constant 0 : i32
    %c0_i32_1 = arith.constant 0 : i32
    return %c0_i32, %c0_i32_0 : i32, i32
  }
  func.func @transform_1(%arg0: i32, %arg1: i32) -> (i32, i32, i32) {
    %c0_i32 = arith.constant 0 : i32
    %c0_i32_0 = arith.constant 0 : i32
    return %arg0, %c0_i32, %arg1 : i32, i32, i32
  }
  func.func @transform_2(%arg0: i32, %arg1: i32) -> (i32, i32, i32) {
    %c0_i32 = arith.constant 0 : i32
    %c0_i32_0 = arith.constant 0 : i32
    return %arg0, %c0_i32, %arg1 : i32, i32, i32
  }
}

module attributes {stable_mosaic.version = 11 : i64} {
  func.func @_lmatmul_kernel(%arg0: i32, %arg1: i32, %arg2: memref<4x2xf32, #tpu.memory_space<vmem>>, %arg3: memref<1x2x128xbf16, #tpu.memory_space<vmem>>, %arg4: memref<1x4x128xf32, #tpu.memory_space<vmem>>) attributes {dimension_semantics = [#tpu.dimension_semantics<parallel>, #tpu.dimension_semantics<parallel>], iteration_bounds = array<i64: 4, 1>, scalar_prefetch = 0 : i64, scratch_operands = 0 : i64, tpu.core_type = #tpu.core_type<tc>, window_params = [{pipeline_mode = #tpu.pipeline_mode<synchronous>, transform_indices = @transform_0, window_bounds = array<i64: 4, 2>}, {transform_indices = @transform_1, window_bounds = array<i64: 1, 2, 128>}, {transform_indices = @transform_2, window_bounds = array<i64: 1, 4, 128>}]} {
    %c0 = arith.constant 0 : index
    %c0_0 = arith.constant 0 : index
    %0 = vector.load %arg2[%c0, %c0_0] : memref<4x2xf32, #tpu.memory_space<vmem>>, vector<4x2xf32>
    %c0_1 = arith.constant 0 : index
    %c0_2 = arith.constant 0 : index
    %c0_3 = arith.constant 0 : index
    %1 = vector.load %arg3[%c0_1, %c0_2, %c0_3] : memref<1x2x128xbf16, #tpu.memory_space<vmem>>, vector<1x2x128xbf16>
    %2 = vector.shape_cast %1 : vector<1x2x128xbf16> to vector<2x128xbf16>
    %3 = arith.extf %2 : vector<2x128xbf16> to vector<2x128xf32>
    %cst = arith.constant dense<0.000000e+00> : vector<4x128xf32>
    %4 = tpu.matmul %0, %3, %cst {dimension_numbers = #tpu.dot_dimension_numbers<[1], [0], [0], [1], [0, 0, 1, 1], [], []>} : vector<4x2xf32>, vector<2x128xf32>, vector<4x128xf32> -> vector<4x128xf32>
    %c0_4 = arith.constant 0 : index
    %c0_5 = arith.constant 0 : index
    %c0_6 = arith.constant 0 : index
    %5 = vector.load %arg4[%c0_4, %c0_5, %c0_6] : memref<1x4x128xf32, #tpu.memory_space<vmem>>, vector<1x4x128xf32>
    %6 = vector.shape_cast %5 : vector<1x4x128xf32> to vector<4x128xf32>
    %7 = vector.shape_cast %4 : vector<4x128xf32> to vector<1x4x128xf32>
    tpu.vector_store %arg4[%c0_4, %c0_5, %c0_6], %7 {strides = array<i32>} : memref<1x4x128xf32, #tpu.memory_space<vmem>>, vector<1x4x128xf32>,
    return
  }
  func.func @transform_0(%arg0: i32, %arg1: i32) -> (i32, i32) {
    %c0_i32 = arith.constant 0 : i32
    %c0_i32_0 = arith.constant 0 : i32
    %c0_i32_1 = arith.constant 0 : i32
    return %c0_i32, %c0_i32_0 : i32, i32
  }
  func.func @transform_1(%arg0: i32, %arg1: i32) -> (i32, i32, i32) {
    %c0_i32 = arith.constant 0 : i32
    %c0_i32_0 = arith.constant 0 : i32
    return %arg0, %c0_i32, %arg1 : i32, i32, i32
  }
  func.func @transform_2(%arg0: i32, %arg1: i32) -> (i32, i32, i32) {
    %c0_i32 = arith.constant 0 : i32
    %c0_i32_0 = arith.constant 0 : i32
    return %arg0, %c0_i32, %arg1 : i32, i32, i32
  }
}

module attributes {stable_mosaic.version = 11 : i64} {
  func.func @_classifier_kernel(%arg0: i32, %arg1: memref<32x512xbf16, #tpu.memory_space<vmem>>, %arg2: memref<32x128xbf16, #tpu.memory_space<vmem>>, %arg3: memref<512x6xbf16, #tpu.memory_space<vmem>>, %arg4: memref<128x6xbf16, #tpu.memory_space<vmem>>, %arg5: memref<1x6xf32, #tpu.memory_space<vmem>>, %arg6: memref<32x6xf32, #tpu.memory_space<vmem>>) attributes {dimension_semantics = [#tpu.dimension_semantics<parallel>], iteration_bounds = array<i64: 1>, scalar_prefetch = 0 : i64, scratch_operands = 0 : i64, tpu.core_type = #tpu.core_type<tc>, window_params = [{transform_indices = @transform_0, window_bounds = array<i64: 32, 512>}, {transform_indices = @transform_1, window_bounds = array<i64: 32, 128>}, {pipeline_mode = #tpu.pipeline_mode<synchronous>, transform_indices = @transform_2, window_bounds = array<i64: 512, 6>}, {pipeline_mode = #tpu.pipeline_mode<synchronous>, transform_indices = @transform_3, window_bounds = array<i64: 128, 6>}, {pipeline_mode = #tpu.pipeline_mode<synchronous>, transform_indices = @transform_4, window_bounds = array<i64: 1, 6>}, {transform_indices = @transform_5, window_bounds = array<i64: 32, 6>}]} {
    %c0 = arith.constant 0 : index
    %c0_0 = arith.constant 0 : index
    %0 = vector.load %arg1[%c0, %c0_0] : memref<32x512xbf16, #tpu.memory_space<vmem>>, vector<32x512xbf16>
    %c0_1 = arith.constant 0 : index
    %c0_2 = arith.constant 0 : index
    %1 = vector.load %arg3[%c0_1, %c0_2] : memref<512x6xbf16, #tpu.memory_space<vmem>>, vector<512x6xbf16>
    %cst = arith.constant dense<0.000000e+00> : vector<32x6xf32>
    %2 = tpu.matmul %0, %1, %cst {dimension_numbers = #tpu.dot_dimension_numbers<[1], [0], [0], [1], [0, 0, 1, 1], [], []>} : vector<32x512xbf16>, vector<512x6xbf16>, vector<32x6xf32> -> vector<32x6xf32>
    %c0_3 = arith.constant 0 : index
    %c0_4 = arith.constant 0 : index
    %3 = vector.load %arg2[%c0_3, %c0_4] : memref<32x128xbf16, #tpu.memory_space<vmem>>, vector<32x128xbf16>
    %c0_5 = arith.constant 0 : index
    %c0_6 = arith.constant 0 : index
    %4 = vector.load %arg4[%c0_5, %c0_6] : memref<128x6xbf16, #tpu.memory_space<vmem>>, vector<128x6xbf16>
    %cst_7 = arith.constant dense<0.000000e+00> : vector<32x6xf32>
    %5 = tpu.matmul %3, %4, %cst_7 {dimension_numbers = #tpu.dot_dimension_numbers<[1], [0], [0], [1], [0, 0, 1, 1], [], []>} : vector<32x128xbf16>, vector<128x6xbf16>, vector<32x6xf32> -> vector<32x6xf32>
    %6 = arith.addf %2, %5 : vector<32x6xf32>
    %c0_8 = arith.constant 0 : index
    %c0_9 = arith.constant 0 : index
    %7 = vector.load %arg5[%c0_8, %c0_9] : memref<1x6xf32, #tpu.memory_space<vmem>>, vector<1x6xf32>
    %8 = vector.broadcast %7 : vector<1x6xf32> to vector<32x6xf32>
    %9 = arith.addf %6, %8 : vector<32x6xf32>
    %c0_10 = arith.constant 0 : index
    %c0_11 = arith.constant 0 : index
    %10 = vector.load %arg6[%c0_10, %c0_11] : memref<32x6xf32, #tpu.memory_space<vmem>>, vector<32x6xf32>
    tpu.vector_store %arg6[%c0_10, %c0_11], %9 {strides = array<i32>} : memref<32x6xf32, #tpu.memory_space<vmem>>, vector<32x6xf32>,
    return
  }
  func.func @transform_0(%arg0: i32) -> (i32, i32) {
    %c0_i32 = arith.constant 0 : i32
    %c0_i32_0 = arith.constant 0 : i32
    return %arg0, %c0_i32 : i32, i32
  }
  func.func @transform_1(%arg0: i32) -> (i32, i32) {
    %c0_i32 = arith.constant 0 : i32
    %c0_i32_0 = arith.constant 0 : i32
    return %arg0, %c0_i32 : i32, i32
  }
  func.func @transform_2(%arg0: i32) -> (i32, i32) {
    %c0_i32 = arith.constant 0 : i32
    %c0_i32_0 = arith.constant 0 : i32
    %c0_i32_1 = arith.constant 0 : i32
    return %c0_i32, %c0_i32_0 : i32, i32
  }
  func.func @transform_3(%arg0: i32) -> (i32, i32) {
    %c0_i32 = arith.constant 0 : i32
    %c0_i32_0 = arith.constant 0 : i32
    %c0_i32_1 = arith.constant 0 : i32
    return %c0_i32, %c0_i32_0 : i32, i32
  }
  func.func @transform_4(%arg0: i32) -> (i32, i32) {
    %c0_i32 = arith.constant 0 : i32
    %c0_i32_0 = arith.constant 0 : i32
    %c0_i32_1 = arith.constant 0 : i32
    return %c0_i32, %c0_i32_0 : i32, i32
  }
  func.func @transform_5(%arg0: i32) -> (i32, i32) {
    %c0_i32 = arith.constant 0 : i32
    %c0_i32_0 = arith.constant 0 : i32
    return %arg0, %c0_i32 : i32, i32
  }
}

module attributes {stable_mosaic.version = 11 : i64} {
  func.func @_rmatmul_kernel(%arg0: i32, %arg1: memref<16x4xf32, #tpu.memory_space<vmem>>, %arg2: memref<4x16xf32, #tpu.memory_space<vmem>>, %arg3: memref<16x16xf32, #tpu.memory_space<vmem>>) attributes {dimension_semantics = [#tpu.dimension_semantics<parallel>], iteration_bounds = array<i64: 3>, scalar_prefetch = 0 : i64, scratch_operands = 0 : i64, tpu.core_type = #tpu.core_type<tc>, window_params = [{transform_indices = @transform_0, window_bounds = array<i64: 16, 4>}, {pipeline_mode = #tpu.pipeline_mode<synchronous>, transform_indices = @transform_1, window_bounds = array<i64: 4, 16>}, {transform_indices = @transform_2, window_bounds = array<i64: 16, 16>}]} {
    %c0 = arith.constant 0 : index
    %c0_0 = arith.constant 0 : index
    %0 = vector.load %arg1[%c0, %c0_0] : memref<16x4xf32, #tpu.memory_space<vmem>>, vector<16x4xf32>
    %c0_1 = arith.constant 0 : index
    %c0_2 = arith.constant 0 : index
    %1 = vector.load %arg2[%c0_1, %c0_2] : memref<4x16xf32, #tpu.memory_space<vmem>>, vector<4x16xf32>
    %cst = arith.constant dense<0.000000e+00> : vector<16x16xf32>
    %2 = tpu.matmul %0, %1, %cst {dimension_numbers = #tpu.dot_dimension_numbers<[1], [0], [0], [1], [0, 0, 1, 1], [], []>} : vector<16x4xf32>, vector<4x16xf32>, vector<16x16xf32> -> vector<16x16xf32>
    %c0_3 = arith.constant 0 : index
    %c0_4 = arith.constant 0 : index
    %3 = vector.load %arg3[%c0_3, %c0_4] : memref<16x16xf32, #tpu.memory_space<vmem>>, vector<16x16xf32>
    tpu.vector_store %arg3[%c0_3, %c0_4], %2 {strides = array<i32>} : memref<16x16xf32, #tpu.memory_space<vmem>>, vector<16x16xf32>,
    return
  }
  func.func @transform_0(%arg0: i32) -> (i32, i32) {
    %c0_i32 = arith.constant 0 : i32
    %c0_i32_0 = arith.constant 0 : i32
    return %arg0, %c0_i32 : i32, i32
  }
  func.func @transform_1(%arg0: i32) -> (i32, i32) {
    %c0_i32 = arith.constant 0 : i32
    %c0_i32_0 = arith.constant 0 : i32
    %c0_i32_1 = arith.constant 0 : i32
    return %c0_i32, %c0_i32_0 : i32, i32
  }
  func.func @transform_2(%arg0: i32) -> (i32, i32) {
    %c0_i32 = arith.constant 0 : i32
    %c0_i32_0 = arith.constant 0 : i32
    return %arg0, %c0_i32 : i32, i32
  }
}

module attributes {stable_mosaic.version = 11 : i64} {
  func.func @_lmatmul_kernel(%arg0: i32, %arg1: i32, %arg2: memref<16x4xf32, #tpu.memory_space<vmem>>, %arg3: memref<1x4x16xf32, #tpu.memory_space<vmem>>, %arg4: memref<1x16x16xf32, #tpu.memory_space<vmem>>) attributes {dimension_semantics = [#tpu.dimension_semantics<parallel>, #tpu.dimension_semantics<parallel>], iteration_bounds = array<i64: 12, 1>, scalar_prefetch = 0 : i64, scratch_operands = 0 : i64, tpu.core_type = #tpu.core_type<tc>, window_params = [{pipeline_mode = #tpu.pipeline_mode<synchronous>, transform_indices = @transform_0, window_bounds = array<i64: 16, 4>}, {transform_indices = @transform_1, window_bounds = array<i64: 1, 4, 16>}, {transform_indices = @transform_2, window_bounds = array<i64: 1, 16, 16>}]} {
    %c0 = arith.constant 0 : index
    %c0_0 = arith.constant 0 : index
    %0 = vector.load %arg2[%c0, %c0_0] : memref<16x4xf32, #tpu.memory_space<vmem>>, vector<16x4xf32>
    %c0_1 = arith.constant 0 : index
    %c0_2 = arith.constant 0 : index
    %c0_3 = arith.constant 0 : index
    %1 = vector.load %arg3[%c0_1, %c0_2, %c0_3] : memref<1x4x16xf32, #tpu.memory_space<vmem>>, vector<1x4x16xf32>
    %2 = vector.shape_cast %1 : vector<1x4x16xf32> to vector<4x16xf32>
    %cst = arith.constant dense<0.000000e+00> : vector<16x16xf32>
    %3 = tpu.matmul %0, %2, %cst {dimension_numbers = #tpu.dot_dimension_numbers<[1], [0], [0], [1], [0, 0, 1, 1], [], []>} : vector<16x4xf32>, vector<4x16xf32>, vector<16x16xf32> -> vector<16x16xf32>
    %c0_4 = arith.constant 0 : index
    %c0_5 = arith.constant 0 : index
    %c0_6 = arith.constant 0 : index
    %4 = vector.load %arg4[%c0_4, %c0_5, %c0_6] : memref<1x16x16xf32, #tpu.memory_space<vmem>>, vector<1x16x16xf32>
    %5 = vector.shape_cast %4 : vector<1x16x16xf32> to vector<16x16xf32>
    %6 = vector.shape_cast %3 : vector<16x16xf32> to vector<1x16x16xf32>
    tpu.vector_store %arg4[%c0_4, %c0_5, %c0_6], %6 {strides = array<i32>} : memref<1x16x16xf32, #tpu.memory_space<vmem>>, vector<1x16x16xf32>,
    return
  }
  func.func @transform_0(%arg0: i32, %arg1: i32) -> (i32, i32) {
    %c0_i32 = arith.constant 0 : i32
    %c0_i32_0 = arith.constant 0 : i32
    %c0_i32_1 = arith.constant 0 : i32
    return %c0_i32, %c0_i32_0 : i32, i32
  }
  func.func @transform_1(%arg0: i32, %arg1: i32) -> (i32, i32, i32) {
    %c0_i32 = arith.constant 0 : i32
    %c0_i32_0 = arith.constant 0 : i32
    return %arg0, %c0_i32, %arg1 : i32, i32, i32
  }
  func.func @transform_2(%arg0: i32, %arg1: i32) -> (i32, i32, i32) {
    %c0_i32 = arith.constant 0 : i32
    %c0_i32_0 = arith.constant 0 : i32
    return %arg0, %c0_i32, %arg1 : i32, i32, i32
  }
}

</mosaic_0001>

<bundles_post_ra>
// kernel: forward.9
= control target key start
LH: loop header
LB: loop body
LE: loop exit
PB: predicated region body
PF: predicated region fallthrough
CT: control target
= control target key end

     0   :  { %s361_s6 = smov 0   ;;  %s363_s7 = smov 0   ;;  %s407_s0 = inlined_call_operand.vmem [shape: bf16[2,4,512], index: 0, kind: input, shape index: {}]   ;;  %s408_s1 = inlined_call_operand.vmem [shape: f32[2,1,512], index: 1, kind: output, shape index: {}]  }
   0x1   :  { %s365_s8 = smov 0  }
   0x2 LB: > { %s23_s9 = sadd.s32 1, %s344_s7  ;;  %p294_p0 = scmp.ge.s32.totalorder %s348_s8, 1  ;;  %s348_s8 = sphi %s365_s8, %s11_s8   ;;  %s344_s7 = sphi %s363_s7, %s412_s7   ;;  %s340_s6 = sphi %s361_s6, %s411_s6  }
   0x3   : > { %p25_p1 = scmp.ge.s32.totalorder %s23_s9, 2  ;;  %p105_p2 = scmp.lt.s32.totalorder %s348_s8, 3 }
   0x5   : > { %s414_s9 = smov (%p25_p1, %s23_s9), 0  ;;  %p106_p3 = pnand %p294_p0, %p105_p2 }
   0x6   : > { %p128_p4 = scmp.lt.s32.totalorder (!%p106_p3), %s340_s6, 1 }
   0x7   : > { %109 = sbr.rel (%p106_p3) target bundleno = 49 (0x31), region = 24 }
   0xc   : > { %v145_v0 = vlaneseq  ;;  %s416_s6 = smov (!%p128_p4, %s340_s6), 1  ;;  %v350_v3 = vmov 0.0   ;;  %vm167_vm1 = vcmask 1043456   ;;  %vm207_vm2 = vcmask 1040384  }
   0xd   : > { %s300_s10 = sshll.u32 %s416_s6, 3  ;;  %s297_s11 = sshll.u32 %s416_s6, 2  ;;  %vm209_vm3 = vcmask 1042434   ;;  %vm211_vm4 = vcmask 1041408  }
   0xe   : > { %vm379_vm0 = vcmp.lt.s32.totalorder %v145_v0, 512  ;;  %s136_s14 = scalar_lea.vmem %s407_s0, %s300_s10  ;;  %s389_s17 = scalar_lea.vmem %s408_s1, %s297_s11 }
   0xf   : > { %v151_v2 = vld [vmem:[%s136_s14] sm:$0xff]  ;;  %149 = vst.msk [vmem:[%s389_s17] sm:$0xf] %vm379_vm0, %v350_v3 }
  0x10   : > { %v152_v4 = vunpack.c.l.bf16 %v151_v2  ;;  %v153_v5 = vunpack.c.h.bf16 %v151_v2 }
  0x12   : > { %156 = vst [vmem:[#allocation1] ss:$2 sm:$0xff] %v152_v4 }
  0x13   : > { %158 = vst [vmem:[#allocation1 + $0x10] ss:$2 sm:$0xff] %v153_v5 }
  0x16   : > { %v150_v45 = vld [vmem:[%s389_s17] sm:$0xf] }
  0x19   : > { %v159_v6 = vld.sshfl [vmem:[#allocation1] sm:$0xff pattern:$0x75316420]  ;;  %v160_v7 = vld.sshfl [vmem:[#allocation1 + $0x8] sm:$0xff pattern:$0x75316420] }
  0x1a   : > { %v161_v8 = vld.sshfl [vmem:[#allocation1 + $0x10] sm:$0xff pattern:$0x75316420]  ;;  %v162_v9 = vld.sshfl [vmem:[#allocation1 + $0x18] sm:$0xff pattern:$0x75316420] }
  0x1b   : > { %v168_v10 = vsel %vm167_vm1, %v159_v6, 0.0  ;;  %v175_v11 = vsel %vm167_vm1, %v160_v7, 0.0  ;;  %v182_v12 = vsel %vm167_vm1, %v161_v8, 0.0  ;;  %v189_v13 = vsel %vm167_vm1, %v162_v9, 0.0 }
  0x1c   : > { %v169_v14 = vrot.slane %v168_v10, 4  ;;  %v176_v15 = vrot.slane %v175_v11, 4  ;;  %v183_v16 = vrot.slane %v182_v12, 4  ;;  %v190_v17 = vrot.slane %v189_v13, 4 }
  0x1e   : > { %v170_v18 = vadd.f32 %v169_v14, %v168_v10  ;;  %v177_v19 = vadd.f32 %v176_v15, %v175_v11  ;;  %v184_v20 = vadd.f32 %v183_v16, %v182_v12  ;;  %v191_v21 = vadd.f32 %v190_v17, %v189_v13 }
  0x20   : > { %v171_v22 = vrot.slane %v170_v18, 2  ;;  %v178_v23 = vrot.slane %v177_v19, 2  ;;  %v185_v24 = vrot.slane %v184_v20, 2  ;;  %v192_v25 = vrot.slane %v191_v21, 2 }
  0x22   : > { %v172_v26 = vadd.f32 %v171_v22, %v170_v18  ;;  %v179_v27 = vadd.f32 %v178_v23, %v177_v19  ;;  %v186_v28 = vadd.f32 %v185_v24, %v184_v20  ;;  %v193_v29 = vadd.f32 %v192_v25, %v191_v21 }
  0x24   : > { %v173_v30 = vrot.slane %v172_v26, 1  ;;  %v180_v31 = vrot.slane %v179_v27, 1  ;;  %v187_v32 = vrot.slane %v186_v28, 1  ;;  %v194_v33 = vrot.slane %v193_v29, 1 }
  0x26   : > { %v174_v34 = vadd.f32 %v173_v30, %v172_v26  ;;  %v181_v35 = vadd.f32 %v180_v31, %v179_v27  ;;  %v188_v36 = vadd.f32 %v187_v32, %v186_v28  ;;  %v195_v37 = vadd.f32 %v194_v33, %v193_v29 }
  0x28   : > { %v197_v38 = vmul.f32 0.25, %v181_v35  ;;  %v198_v39 = vmul.f32 0.25, %v188_v36  ;;  %v199_v40 = vmul.f32 0.25, %v195_v37  ;;  %v196_v41 = vmul.f32 0.25, %v174_v34 }
  0x2a   : > { %v204_v42 = vrot.slane %v197_v38, 7  ;;  %v205_v43 = vrot.slane %v198_v39, 6  ;;  %v206_v44 = vrot.slane %v199_v40, 5 }
  0x2c   : > { %v208_v46 = vsel %vm207_vm2, %v196_v41, %v204_v42  ;;  %v210_v47 = vsel %vm209_vm3, %v205_v43, %v206_v44 }
  0x2d   : > { %v212_v48 = vsel %vm211_vm4, %v208_v46, %v210_v47 }
  0x2e   : > { %v214_v49 = vadd.f32 %v212_v48, %v150_v45 }
  0x30   : > { %219 = vst.msk [vmem:[%s389_s17] sm:$0xf] %vm379_vm0, %v214_v49 }
  0x31 PF: > { %s11_s8 = sadd.s32 1, %s348_s8   ;;  %s411_s6 = smov %s344_s7 }
  0x32   : > { %p8_p5 = scmp.ge.s32.totalorder %s11_s8, 4   ;;  %s412_s7 = smov %s414_s9 }
  0x34   :  { %10 = sbr.rel (!%p8_p5) target bundleno = 2 (0x2), region = 59 }

// kernel: forward.10
= control target key start
LH: loop header
LB: loop body
LE: loop exit
PB: predicated region body
PF: predicated region fallthrough
CT: control target
= control target key end

     0   :  { %s949_s18 = smov 0   ;;  %s951_s19 = smov 0   ;;  %s1092_s0 = inlined_call_operand.vmem [shape: bf16[2,4,512], index: 0, kind: input, shape index: {}]   ;;  %s1093_s1 = inlined_call_operand.vmem [shape: bf16[512,128], index: 1, kind: input, shape index: {}]   ;;  %s1094_s2 = inlined_call_operand.vmem [shape: f32[1,128], index: 2, kind: input, shape index: {}]   ;;  %s1095_s3 = inlined_call_operand.vmem [shape: f32[1,128], index: 3, kind: input, shape index: {}]   ;;  %s1096_s4 = inlined_call_operand.vmem [shape: f32[2,1,128], index: 4, kind: input, shape index: {}]   ;;  %s1097_s5 = inlined_call_operand.vmem [shape: bf16[2,4,128], index: 5, kind: output, shape index: {}]  }
   0x1   :  { %s953_s20 = smov 0  }
   0x2 LB: > { %s27_s21 = sadd.s32 1, %s913_s19  ;;  %p701_p0 = scmp.ge.s32.totalorder %s917_s20, 1  ;;  %s917_s20 = sphi %s953_s20, %s15_s20   ;;  %s913_s19 = sphi %s951_s19, %s1099_s19   ;;  %s909_s18 = sphi %s949_s18, %s1098_s18  }
   0x3   : > { %p29_p1 = scmp.ge.s32.totalorder %s27_s21, 2  ;;  %p215_p2 = scmp.lt.s32.totalorder %s917_s20, 3 }
   0x5   : > { %s1101_s21 = smov (%p29_p1, %s27_s21), 0  ;;  %p216_p3 = pnand %p701_p0, %p215_p2 }
   0x6   : > { %p252_p4 = scmp.lt.s32.totalorder (!%p216_p3), %s909_s18, 1 }
   0x7   : > { %219 = sbr.rel (%p216_p3) target bundleno = 193 (0xc1), region = 40 }
   0xc   : > { %v843_v0 = vld [vmem:[%s1093_s1 + $0x38] sm:$0xff]  ;;  %v842_v4 = vld [vmem:[%s1093_s1 + $0x30] sm:$0xff]  ;;  %s1103_s18 = smov (!%p252_p4, %s909_s18), 1  ;;  %v841_v8 = vld [vmem:[%s1093_s1 + $0x28] sm:$0xff] }
   0xd   : > { %v851_v1 = vld [vmem:[%s1093_s1 + $0x78] sm:$0xff]  ;;  %538 = vmatpush.bf16.msra.mxu0 %v843_v0  ;;  %v850_v5 = vld [vmem:[%s1093_s1 + $0x70] sm:$0xff]  ;;  %s835_s13 = sshll.u32 %s1103_s18, 3  ;;  %v849_v9 = vld [vmem:[%s1093_s1 + $0x68] sm:$0xff]  ;;  %s263_s29 = scalar_lea.vmem %s1096_s4, %s1103_s18 }
   0xe   : > { %v859_v2 = vld [vmem:[%s1093_s1 + $0xb8] sm:$0xff]  ;;  %551 = vmatpush.bf16.msra.mxu1 %v851_v1  ;;  %v858_v6 = vld [vmem:[%s1093_s1 + $0xb0] sm:$0xff]  ;;  %v857_v10 = vld [vmem:[%s1093_s1 + $0xa8] sm:$0xff]  ;;  %s260_s28 = scalar_lea.vmem %s1092_s0, %s835_s13  ;;  %s704_s9 = sshll.u32 %s1103_s18, 1 }
   0xf   : > { %v867_v3 = vld [vmem:[%s1093_s1 + $0xf8] sm:$0xff]  ;;  %564 = vmatpush.bf16.msra.mxu2 %v859_v2  ;;  %v866_v7 = vld [vmem:[%s1093_s1 + $0xf0] sm:$0xff]  ;;  %v865_v11 = vld [vmem:[%s1093_s1 + $0xe8] sm:$0xff]  ;;  %s270_s12 = scalar_lea.vmem %s1097_s5, %s704_s9 }
  0x10   : > { %577 = vmatpush.bf16.msra.mxu3 %v867_v3  ;;  %v840_v12 = vld [vmem:[%s1093_s1 + $0x20] sm:$0xff]  ;;  %v839_v17 = vld [vmem:[%s1093_s1 + $0x18] sm:$0xff]  ;;  %v838_v21 = vld [vmem:[%s1093_s1 + $0x10] sm:$0xff] }
  0x11   : > { %539 = vmatpush.bf16.msra.mxu0 %v842_v4  ;;  %v848_v13 = vld [vmem:[%s1093_s1 + $0x60] sm:$0xff]  ;;  %v847_v18 = vld [vmem:[%s1093_s1 + $0x58] sm:$0xff]  ;;  %v846_v22 = vld [vmem:[%s1093_s1 + $0x50] sm:$0xff] }
  0x12   : > { %552 = vmatpush.bf16.msra.mxu1 %v850_v5  ;;  %v856_v14 = vld [vmem:[%s1093_s1 + $0xa0] sm:$0xff]  ;;  %v855_v19 = vld [vmem:[%s1093_s1 + $0x98] sm:$0xff]  ;;  %v854_v23 = vld [vmem:[%s1093_s1 + $0x90] sm:$0xff] }
  0x13   : > { %565 = vmatpush.bf16.msra.mxu2 %v858_v6  ;;  %v864_v15 = vld [vmem:[%s1093_s1 + $0xe0] sm:$0xff]  ;;  %v863_v20 = vld [vmem:[%s1093_s1 + $0xd8] sm:$0xff]  ;;  %v862_v24 = vld [vmem:[%s1093_s1 + $0xd0] sm:$0xff] }
  0x14   : > { %578 = vmatpush.bf16.msra.mxu3 %v866_v7  ;;  %v271_v16 = vld [vmem:[%s260_s28] sm:$0xff]  ;;  %v837_v25 = vld [vmem:[%s1093_s1 + $0x8] sm:$0xff] }
  0x15   : > { %540 = vmatpush.bf16.msra.mxu0 %v841_v8  ;;  %337 = vst [vmem:[#allocation1] ss:$4 sm:$0xff] %v271_v16  ;;  %v845_v26 = vld [vmem:[%s1093_s1 + $0x48] sm:$0xff]  ;;  %v836_v29 = vld [vmem:[%s1093_s1] sm:$0xff] }
  0x16   : > { %553 = vmatpush.bf16.msra.mxu1 %v849_v9  ;;  %v853_v27 = vld [vmem:[%s1093_s1 + $0x88] sm:$0xff]  ;;  %v844_v30 = vld [vmem:[%s1093_s1 + $0x40] sm:$0xff] }
  0x17   : > { %566 = vmatpush.bf16.msra.mxu2 %v857_v10  ;;  %v861_v28 = vld [vmem:[%s1093_s1 + $0xc8] sm:$0xff]  ;;  %v852_v31 = vld [vmem:[%s1093_s1 + $0x80] sm:$0xff] }
  0x18   : > { %579 = vmatpush.bf16.msra.mxu3 %v865_v11  ;;  %v860_v32 = vld [vmem:[%s1093_s1 + $0xc0] sm:$0xff] }
  0x19   : > { %541 = vmatpush.bf16.msra.mxu0 %v840_v12  ;;  %v892_v43 = vld [vmem:[%s1094_s2] ss:$0 sm:$0xff] }
  0x1a   : > { %554 = vmatpush.bf16.msra.mxu1 %v848_v13  ;;  %v893_v47 = vld [vmem:[%s1095_s3] ss:$0 sm:$0xff] }
  0x1b   : > { %567 = vmatpush.bf16.msra.mxu2 %v856_v14  ;;  %v894_v50 = vld [vmem:[%s263_s29] ss:$0 sm:$0xff] }
  0x1c   : > { %580 = vmatpush.bf16.msra.mxu3 %v864_v15  ;;  %v338_v33 = vld.sshfl [vmem:[#allocation1] sm:$0xff pattern:$0x73625140]  ;;  %v339_v34 = vld.sshfl [vmem:[#allocation1 + $0x8] sm:$0xff pattern:$0x73625140] }
  0x1d   : > { %542 = vmatpush.bf16.msra.mxu0 %v839_v17  ;;  %v340_v35 = vld.sshfl [vmem:[#allocation1 + $0x10] sm:$0xff pattern:$0x73625140]  ;;  %v341_v36 = vld.sshfl [vmem:[#allocation1 + $0x18] sm:$0xff pattern:$0x73625140] }
  0x1e   : > { %555 = vmatpush.bf16.msra.mxu1 %v847_v18 }
  0x1f   : > { %568 = vmatpush.bf16.msra.mxu2 %v855_v19 }
  0x20   : > { %581 = vmatpush.bf16.msra.mxu3 %v863_v20 }
  0x21   : > { %543 = vmatpush.bf16.msra.mxu0 %v838_v21 }
  0x22   : > { %556 = vmatpush.bf16.msra.mxu1 %v846_v22 }
  0x23   : > { %569 = vmatpush.bf16.msra.mxu2 %v854_v23 }
  0x24   : > { %582 = vmatpush.bf16.msra.mxu3 %v862_v24 }
  0x25   : > { %544 = vmatpush.bf16.msra.mxu0 %v837_v25 }
  0x26   : > { %557 = vmatpush.bf16.msra.mxu1 %v845_v26 }
  0x27   : > { %570 = vmatpush.bf16.msra.mxu2 %v853_v27 }
  0x28   : > { %583 = vmatpush.bf16.msra.mxu3 %v861_v28 }
  0x29   : > { %545 = vmatpush.bf16.msra.mxu0 %v836_v29 }
  0x2a   : > { %558 = vmatpush.bf16.msra.mxu1 %v844_v30 }
  0x2b   : > { %571 = vmatpush.bf16.msra.mxu2 %v852_v31 }
  0x2c   : > { %584 = vmatpush.bf16.msra.mxu3 %v860_v32  ;;  %546 = vmatmul.bf16.vlgmr.msra.gmra.mxu0 %v338_v33 }
  0x2d   : > { %559 = vmatmul.bf16.vlgmr.msra.gmra.mxu1 %v339_v34 }
  0x2e   : > { %572 = vmatmul.bf16.vlgmr.msra.gmra.mxu2 %v340_v35 }
  0x2f   : > { %585 = vmatmul.bf16.vlgmr.msra.gmra.mxu3 %v341_v36 }
  0xa9   : > { %v547_v37 = vpop.f32.mrf.mxu0 }
  0xaa   : > { %v560_v38 = vpop.f32.mrf.mxu1 }
  0xab   : > { %v561_v39 = vadd.f32 %v560_v38, %v547_v37 }
  0xb1   : > { %v573_v40 = vpop.f32.mrf.mxu2  ;;  %v549_v44 = vpop.f32.mrf.mxu0 }
  0xb2   : > { %v586_v41 = vpop.f32.mrf.mxu3  ;;  %v574_v42 = vadd.f32 %v573_v40, %v561_v39  ;;  %v562_v45 = vpop.f32.mrf.mxu1 }
  0xb4   : > { %v587_v46 = vadd.f32 %v586_v41, %v574_v42 }
  0xb6   : > { %v594_v48 = vmul.f32 %v892_v43, %v587_v46 }
  0xb8   : > { %v599_v49 = vadd.f32 %v893_v47, %v594_v48 }
  0xb9   : > { %v575_v51 = vpop.f32.mrf.mxu2 }
  0xba   : > { %v588_v52 = vpop.f32.mrf.mxu3  ;;  %v600_v53 = vmax.f32 %v599_v49, 0.0 }
  0xbc   : > { %v605_v54 = vmul.f32 %v894_v50, %v600_v53 }
  0xbe   : > { %v606_v55 = vpack.c.bf16 %v605_v54, %v605_v54 }
  0xc0   : > { %607 = vst [vmem:[%s270_s12] sm:$0x3] %v606_v55 }
  0xc1 PF: > { %s15_s20 = sadd.s32 1, %s917_s20   ;;  %s1098_s18 = smov %s913_s19 }
  0xc2   : > { %p12_p5 = scmp.ge.s32.totalorder %s15_s20, 4   ;;  %s1099_s19 = smov %s1101_s21 }
  0xc4   :  { %14 = sbr.rel (!%p12_p5) target bundleno = 2 (0x2), region = 73 }

// kernel: forward.8
= control target key start
LH: loop header
LB: loop body
LE: loop exit
PB: predicated region body
PF: predicated region fallthrough
CT: control target
= control target key end

     0   :  { %9 = vsyncpa [#allocation3], 0  ;;  %s1735_s18 = smov [#allocation2]   ;;  %s1736_s20 = smov 256   ;;  %s1808_s0 = inlined_call_operand.vmem [shape: bf16[8,512], index: 0, kind: input, shape index: {}]   ;;  %s1809_s1 = inlined_call_operand.hbm [shape: bf16[512,512], index: 1, kind: input, shape index: {}]   ;;  %s1810_s2 = inlined_call_operand.vmem [shape: f32[1,512], index: 2, kind: input, shape index: {}]   ;;  %s1811_s3 = inlined_call_operand.vmem [shape: f32[1,512], index: 3, kind: input, shape index: {}]   ;;  %s1812_s4 = inlined_call_operand.vmem [shape: bf16[8,512], index: 4, kind: output, shape index: {}]  }
   0x1   :  { %s16_s17 = sshll.u32 %s1809_s1, 4  ;;  %s18_s19 = sshll.u32 %s1735_s18, 4  ;;  %s17_s17 = int_to_ptr.hbm [resolvable:$true] %s16_s17  ;;  %s19_s19 = int_to_ptr.vmem [resolvable:$true] %s18_s19 }
   0x2   :  { %s1737_s21 = smov 16  }
   0x3   :  { %24 = dma.hbm_to_vmem [thread:$0]  %s17_s17, 16384, %s19_s19, [#allocation3], %s1736_s20, %s1736_s20, %s1737_s21  }
   0x4   :  { %1733 = dma.done.wait [#allocation3], 16384  }
   0x5   :  { %1734 = vsyncadd [#allocation3], 4294950912  ;;  %v1180_v0 = vld [vmem:[#allocation2 + $0xe0] sm:$0xf]  ;;  %v1608_v1 = vld [vmem:[#allocation2 + $0xec] sm:$0xf0] }
   0x6   :  { %v1308_v2 = vld [vmem:[#allocation2 + $0x1e0] sm:$0xf]  ;;  %v1181_v3 = vor.u32 %v1608_v1, %v1180_v0  ;;  %v1640_v4 = vld [vmem:[#allocation2 + $0x1ec] sm:$0xf0] }
   0x7   :  { %v1436_v5 = vld [vmem:[#allocation2 + $0x2e0] sm:$0xf]  ;;  %v1672_v6 = vld [vmem:[#allocation2 + $0x2ec] sm:$0xf0]  ;;  %v1309_v7 = vor.u32 %v1640_v4, %v1308_v2 }
   0x8   :  { %v1437_v8 = vor.u32 %v1672_v6, %v1436_v5  ;;  %v1564_v9 = vld [vmem:[#allocation2 + $0x3e0] sm:$0xf]  ;;  %v1704_v10 = vld [vmem:[#allocation2 + $0x3ec] sm:$0xf0]  ;;  %817 = vmatpush.bf16.msra.mxu0 %v1181_v3 }
   0x9   :  { %v1164_v11 = vld [vmem:[#allocation2 + $0xc0] sm:$0xf]  ;;  %v1565_v12 = vor.u32 %v1704_v10, %v1564_v9  ;;  %v1604_v13 = vld [vmem:[#allocation2 + $0xcc] sm:$0xf0]  ;;  %830 = vmatpush.bf16.msra.mxu1 %v1309_v7 }
   0xa   :  { %v1292_v14 = vld [vmem:[#allocation2 + $0x1c0] sm:$0xf]  ;;  %v1636_v15 = vld [vmem:[#allocation2 + $0x1cc] sm:$0xf0]  ;;  %843 = vmatpush.bf16.msra.mxu2 %v1437_v8  ;;  %v1165_v16 = vor.u32 %v1604_v13, %v1164_v11 }
   0xb   :  { %v1293_v17 = vor.u32 %v1636_v15, %v1292_v14  ;;  %v1420_v18 = vld [vmem:[#allocation2 + $0x2c0] sm:$0xf]  ;;  %v1668_v19 = vld [vmem:[#allocation2 + $0x2cc] sm:$0xf0]  ;;  %856 = vmatpush.bf16.msra.mxu3 %v1565_v12 }
   0xc   :  { %v1548_v20 = vld [vmem:[#allocation2 + $0x3c0] sm:$0xf]  ;;  %v1421_v21 = vor.u32 %v1668_v19, %v1420_v18  ;;  %v1700_v22 = vld [vmem:[#allocation2 + $0x3cc] sm:$0xf0]  ;;  %818 = vmatpush.bf16.msra.mxu0 %v1165_v16 }
   0xd   :  { %v1148_v23 = vld [vmem:[#allocation2 + $0xa0] sm:$0xf]  ;;  %v1600_v24 = vld [vmem:[#allocation2 + $0xac] sm:$0xf0]  ;;  %v1549_v25 = vor.u32 %v1700_v22, %v1548_v20  ;;  %831 = vmatpush.bf16.msra.mxu1 %v1293_v17 }
   0xe   :  { %v1276_v26 = vld [vmem:[#allocation2 + $0x1a0] sm:$0xf]  ;;  %v1632_v27 = vld [vmem:[#allocation2 + $0x1ac] sm:$0xf0]  ;;  %v1149_v29 = vor.u32 %v1600_v24, %v1148_v23  ;;  %844 = vmatpush.bf16.msra.mxu2 %v1421_v21 }
   0xf   :  { %v1404_v28 = vld [vmem:[#allocation2 + $0x2a0] sm:$0xf]  ;;  %v1664_v30 = vld [vmem:[#allocation2 + $0x2ac] sm:$0xf0]  ;;  %v1277_v33 = vor.u32 %v1632_v27, %v1276_v26  ;;  %857 = vmatpush.bf16.msra.mxu3 %v1549_v25 }
  0x10   :  { %v1532_v31 = vld [vmem:[#allocation2 + $0x3a0] sm:$0xf]  ;;  %v1696_v32 = vld [vmem:[#allocation2 + $0x3ac] sm:$0xf0]  ;;  %v1405_v34 = vor.u32 %v1664_v30, %v1404_v28  ;;  %819 = vmatpush.bf16.msra.mxu0 %v1149_v29  ;;  %v1606_v28 = vld [vmem:[#allocation2 + $0xe4] sm:$0xf] }
  0x11   :  { %v1132_v35 = vld [vmem:[#allocation2 + $0x80] sm:$0xf]  ;;  %v1596_v36 = vld [vmem:[#allocation2 + $0x8c] sm:$0xf0]  ;;  %v1533_v38 = vor.u32 %v1696_v32, %v1532_v31  ;;  %832 = vmatpush.bf16.msra.mxu1 %v1277_v33  ;;  %v1182_v29 = vld [vmem:[#allocation2 + $0xf0] sm:$0xf0] }
  0x12   :  { %v1260_v37 = vld [vmem:[#allocation2 + $0x180] sm:$0xf]  ;;  %v1628_v39 = vld [vmem:[#allocation2 + $0x18c] sm:$0xf0]  ;;  %v1133_v44 = vor.u32 %v1596_v36, %v1132_v35  ;;  %845 = vmatpush.bf16.msra.mxu2 %v1405_v34  ;;  %v1638_v30 = vld [vmem:[#allocation2 + $0x1e4] sm:$0xf] }
  0x13   :  { %v1388_v40 = vld [vmem:[#allocation2 + $0x280] sm:$0xf]  ;;  %v1660_v41 = vld [vmem:[#allocation2 + $0x28c] sm:$0xf0]  ;;  %v1261_v45 = vor.u32 %v1628_v39, %v1260_v37  ;;  %858 = vmatpush.bf16.msra.mxu3 %v1533_v38  ;;  %v1310_v32 = vld [vmem:[#allocation2 + $0x1f0] sm:$0xf0] }
  0x14   :  { %v1516_v42 = vld [vmem:[#allocation2 + $0x380] sm:$0xf]  ;;  %v1692_v43 = vld [vmem:[#allocation2 + $0x38c] sm:$0xf0]  ;;  %v1389_v46 = vor.u32 %v1660_v41, %v1388_v40  ;;  %820 = vmatpush.bf16.msra.mxu0 %v1133_v44  ;;  %v1670_v33 = vld [vmem:[#allocation2 + $0x2e4] sm:$0xf]  ;;  %v1185_v40 = vor.u32 %v1606_v28, %v1182_v29  ;;  %v1313_v41 = vor.u32 %v1638_v30, %v1310_v32 }
  0x15   :  { %v1116_v47 = vld [vmem:[#allocation2 + $0x60] sm:$0xf]  ;;  %v1592_v48 = vld [vmem:[#allocation2 + $0x6c] sm:$0xf0]  ;;  %v1517_v50 = vor.u32 %v1692_v43, %v1516_v42  ;;  %833 = vmatpush.bf16.msra.mxu1 %v1261_v45  ;;  %v1438_v34 = vld [vmem:[#allocation2 + $0x2f0] sm:$0xf0] }
  0x16   :  { %v1244_v49 = vld [vmem:[#allocation2 + $0x160] sm:$0xf]  ;;  %v1624_v51 = vld [vmem:[#allocation2 + $0x16c] sm:$0xf0]  ;;  %v1117_v56 = vor.u32 %v1592_v48, %v1116_v47  ;;  %846 = vmatpush.bf16.msra.mxu2 %v1389_v46  ;;  %v1702_v37 = vld [vmem:[#allocation2 + $0x3e4] sm:$0xf]  ;;  %v1441_v42 = vor.u32 %v1670_v33, %v1438_v34 }
  0x17   :  { %v1372_v52 = vld [vmem:[#allocation2 + $0x260] sm:$0xf]  ;;  %v1656_v53 = vld [vmem:[#allocation2 + $0x26c] sm:$0xf0]  ;;  %v1245_v57 = vor.u32 %v1624_v51, %v1244_v49  ;;  %859 = vmatpush.bf16.msra.mxu3 %v1517_v50  ;;  %v1566_v38 = vld [vmem:[#allocation2 + $0x3f0] sm:$0xf0] }
  0x18   :  { %v1500_v54 = vld [vmem:[#allocation2 + $0x360] sm:$0xf]  ;;  %v1688_v55 = vld [vmem:[#allocation2 + $0x36c] sm:$0xf0]  ;;  %v1373_v58 = vor.u32 %v1656_v53, %v1372_v52  ;;  %821 = vmatpush.bf16.msra.mxu0 %v1117_v56  ;;  %v1602_v43 = vld [vmem:[#allocation2 + $0xc4] sm:$0xf]  ;;  %v1569_v46 = vor.u32 %v1702_v37, %v1566_v38 }
  0x19   :  { %v1100_v59 = vld [vmem:[#allocation2 + $0x40] sm:$0xf]  ;;  %v1588_v60 = vld [vmem:[#allocation2 + $0x4c] sm:$0xf0]  ;;  %v1501_v62 = vor.u32 %v1688_v55, %v1500_v54  ;;  %834 = vmatpush.bf16.msra.mxu1 %v1245_v57  ;;  %v1166_v44 = vld [vmem:[#allocation2 + $0xd0] sm:$0xf0] }
  0x1a   :  { %v1228_v61 = vld [vmem:[#allocation2 + $0x140] sm:$0xf]  ;;  %v1620_v63 = vld [vmem:[#allocation2 + $0x14c] sm:$0xf0]  ;;  %v1101_v4 = vor.u32 %v1588_v60, %v1100_v59  ;;  %847 = vmatpush.bf16.msra.mxu2 %v1373_v58  ;;  %v1634_v45 = vld [vmem:[#allocation2 + $0x1c4] sm:$0xf]  ;;  %v1169_v53 = vor.u32 %v1602_v43, %v1166_v44 }
  0x1b   :  { %v1356_v0 = vld [vmem:[#allocation2 + $0x240] sm:$0xf]  ;;  %v1652_v1 = vld [vmem:[#allocation2 + $0x24c] sm:$0xf0]  ;;  %v1229_v5 = vor.u32 %v1620_v63, %v1228_v61  ;;  %860 = vmatpush.bf16.msra.mxu3 %v1501_v62  ;;  %v1294_v47 = vld [vmem:[#allocation2 + $0x1d0] sm:$0xf0] }
  0x1c   :  { %v1484_v2 = vld [vmem:[#allocation2 + $0x340] sm:$0xf]  ;;  %v1684_v3 = vld [vmem:[#allocation2 + $0x34c] sm:$0xf0]  ;;  %v1357_v6 = vor.u32 %v1652_v1, %v1356_v0  ;;  %822 = vmatpush.bf16.msra.mxu0 %v1101_v4  ;;  %v1666_v48 = vld [vmem:[#allocation2 + $0x2c4] sm:$0xf]  ;;  %v1297_v57 = vor.u32 %v1634_v45, %v1294_v47 }
  0x1d   :  { %v1084_v7 = vld [vmem:[#allocation2 + $0x20] sm:$0xf]  ;;  %v1584_v8 = vld [vmem:[#allocation2 + $0x2c] sm:$0xf0]  ;;  %v1485_v10 = vor.u32 %v1684_v3, %v1484_v2  ;;  %835 = vmatpush.bf16.msra.mxu1 %v1229_v5  ;;  %v1422_v49 = vld [vmem:[#allocation2 + $0x2d0] sm:$0xf0] }
  0x1e   :  { %v1212_v9 = vld [vmem:[#allocation2 + $0x120] sm:$0xf]  ;;  %v1616_v11 = vld [vmem:[#allocation2 + $0x12c] sm:$0xf0]  ;;  %v1085_v16 = vor.u32 %v1584_v8, %v1084_v7  ;;  %848 = vmatpush.bf16.msra.mxu2 %v1357_v6  ;;  %v1698_v50 = vld [vmem:[#allocation2 + $0x3c4] sm:$0xf]  ;;  %v1425_v58 = vor.u32 %v1666_v48, %v1422_v49 }
  0x1f   :  { %v1340_v12 = vld [vmem:[#allocation2 + $0x220] sm:$0xf]  ;;  %v1648_v13 = vld [vmem:[#allocation2 + $0x22c] sm:$0xf0]  ;;  %v1213_v19 = vor.u32 %v1616_v11, %v1212_v9  ;;  %861 = vmatpush.bf16.msra.mxu3 %v1485_v10  ;;  %v1550_v51 = vld [vmem:[#allocation2 + $0x3d0] sm:$0xf0] }
  0x20   :  { %v1468_v14 = vld [vmem:[#allocation2 + $0x320] sm:$0xf]  ;;  %v1680_v15 = vld [vmem:[#allocation2 + $0x32c] sm:$0xf0]  ;;  %v1341_v20 = vor.u32 %v1648_v13, %v1340_v12  ;;  %823 = vmatpush.bf16.msra.mxu0 %v1085_v16  ;;  %v34_v52 = vld [vmem:[%s1808_s0 + $0x8] sm:$0xff]  ;;  %v1553_v62 = vor.u32 %v1698_v50, %v1550_v51 }
  0x21   :  { %v1068_v17 = vld [vmem:[#allocation2] sm:$0xf]  ;;  %v1580_v18 = vld [vmem:[#allocation2 + $0xc] sm:$0xf0]  ;;  %v1469_v24 = vor.u32 %v1680_v15, %v1468_v14  ;;  %836 = vmatpush.bf16.msra.mxu1 %v1213_v19  ;;  %v1598_v54 = vld [vmem:[#allocation2 + $0xa4] sm:$0xf]  ;;  %v167_v55 = vunpack.c.l.b16 %v34_v52  ;;  %v168_v56 = vunpack.c.h.b16 %v34_v52 }
  0x22   :  { %v1196_v21 = vld [vmem:[#allocation2 + $0x100] sm:$0xf]  ;;  %v1612_v22 = vld [vmem:[#allocation2 + $0x10c] sm:$0xf0]  ;;  %v1069_v31 = vor.u32 %v1580_v18, %v1068_v17  ;;  %849 = vmatpush.bf16.msra.mxu2 %v1341_v20  ;;  %v1150_v59 = vld [vmem:[#allocation2 + $0xb0] sm:$0xf0] }
  0x23   :  { %v1324_v23 = vld [vmem:[#allocation2 + $0x200] sm:$0xf]  ;;  %v1644_v25 = vld [vmem:[#allocation2 + $0x20c] sm:$0xf0]  ;;  %v1197_v35 = vor.u32 %v1612_v22, %v1196_v21  ;;  %862 = vmatpush.bf16.msra.mxu3 %v1469_v24  ;;  %v1630_v60 = vld [vmem:[#allocation2 + $0x1a4] sm:$0xf]  ;;  %v1769_v1 = vpack.c.b16 %v167_v55, %v167_v55  ;;  %v1774_v5 = vpack.c.b16 %v168_v56, %v168_v56  ;;  %v1153_v8 = vor.u32 %v1598_v54, %v1150_v59 }
  0x24   :  { %v1452_v26 = vld [vmem:[#allocation2 + $0x300] sm:$0xf]  ;;  %v1676_v27 = vld [vmem:[#allocation2 + $0x30c] sm:$0xf0]  ;;  %v1325_v36 = vor.u32 %v1644_v25, %v1324_v23  ;;  %824 = vmatpush.bf16.msra.mxu0 %v1069_v31  ;;  %v1278_v61 = vld [vmem:[#allocation2 + $0x1b0] sm:$0xf0] }
  0x25   :  { %v1453_v39 = vor.u32 %v1676_v27, %v1452_v26  ;;  %837 = vmatpush.bf16.msra.mxu1 %v1197_v35  ;;  %v1662_v63 = vld [vmem:[#allocation2 + $0x2a4] sm:$0xf]  ;;  %v1406_v0 = vld [vmem:[#allocation2 + $0x2b0] sm:$0xf0]  ;;  %v1281_v9 = vor.u32 %v1630_v60, %v1278_v61 }
  0x26   :  { %850 = vmatpush.bf16.msra.mxu2 %v1325_v36  ;;  %v33_v2 = vld [vmem:[%s1808_s0] sm:$0xff]  ;;  %v1534_v4 = vld [vmem:[#allocation2 + $0x3b0] sm:$0xf0]  ;;  %v1409_v10 = vor.u32 %v1662_v63, %v1406_v0 }
  0x27   :  { %863 = vmatpush.bf16.msra.mxu3 %v1453_v39  ;;  %v1694_v3 = vld [vmem:[#allocation2 + $0x3a4] sm:$0xf]  ;;  %v165_v6 = vunpack.c.l.b16 %v33_v2  ;;  %v166_v7 = vunpack.c.h.b16 %v33_v2  ;;  %v1134_v12 = vld [vmem:[#allocation2 + $0x90] sm:$0xf0] }
  0x28   :  { %869 = vmatpush.bf16.msrb.mxu0 %v1185_v40  ;;  %v1594_v11 = vld [vmem:[#allocation2 + $0x84] sm:$0xf]  ;;  %v1537_v16 = vor.u32 %v1694_v3, %v1534_v4  ;;  %v1262_v17 = vld [vmem:[#allocation2 + $0x190] sm:$0xf0] }
  0x29   :  { %882 = vmatpush.bf16.msrb.mxu1 %v1313_v41  ;;  %851 = vmatmul.bf16.vlgmr.msra.gmra.mxu2 %v1769_v1  ;;  %v1626_v13 = vld [vmem:[#allocation2 + $0x184] sm:$0xf]  ;;  %v1777_v14 = vpack.c.b16 %v165_v6, %v165_v6  ;;  %v1779_v15 = vpack.c.b16 %v166_v7, %v166_v7  ;;  %v1390_v19 = vld [vmem:[#allocation2 + $0x290] sm:$0xf0]  ;;  %v1137_v22 = vor.u32 %v1594_v11, %v1134_v12  ;;  %v1641_v12 = vld [vmem:[#allocation2 + $0x1f4] sm:$0xf0] }
  0x2a   :  { %895 = vmatpush.bf16.msrb.mxu2 %v1441_v42  ;;  %v1658_v18 = vld [vmem:[#allocation2 + $0x284] sm:$0xf]  ;;  %v1518_v21 = vld [vmem:[#allocation2 + $0x390] sm:$0xf0]  ;;  %864 = vmatmul.bf16.vlgmr.msra.gmra.mxu3 %v1774_v5  ;;  %v1265_v23 = vor.u32 %v1626_v13, %v1262_v17  ;;  %v1444_v13 = vld [vmem:[#allocation2 + $0x2e8] sm:$0xf] }
  0x2b   :  { %908 = vmatpush.bf16.msrb.mxu3 %v1569_v46  ;;  %v1690_v20 = vld [vmem:[#allocation2 + $0x384] sm:$0xf]  ;;  %825 = vmatmul.bf16.vlgmr.msra.gmra.mxu0 %v1777_v14  ;;  %v1393_v24 = vor.u32 %v1658_v18, %v1390_v19  ;;  %v1118_v26 = vld [vmem:[#allocation2 + $0x70] sm:$0xf0]  ;;  %v1572_v19 = vld [vmem:[#allocation2 + $0x3e8] sm:$0xf] }
  0x2c   :  { %870 = vmatpush.bf16.msrb.mxu0 %v1169_v53  ;;  %838 = vmatmul.bf16.vlgmr.msra.gmra.mxu1 %v1779_v15  ;;  %v1590_v25 = vld [vmem:[#allocation2 + $0x64] sm:$0xf]  ;;  %v1521_v28 = vor.u32 %v1690_v20, %v1518_v21  ;;  %v1246_v29 = vld [vmem:[#allocation2 + $0x170] sm:$0xf0]  ;;  %v1705_v20 = vld [vmem:[#allocation2 + $0x3f4] sm:$0xf0] }
  0x2d   :  { %883 = vmatpush.bf16.msrb.mxu1 %v1297_v57  ;;  %v1622_v27 = vld [vmem:[#allocation2 + $0x164] sm:$0xf]  ;;  %v1374_v31 = vld [vmem:[#allocation2 + $0x270] sm:$0xf0]  ;;  %v1121_v34 = vor.u32 %v1590_v25, %v1118_v26  ;;  %v1172_v25 = vld [vmem:[#allocation2 + $0xc8] sm:$0xf] }
  0x2e   :  { %896 = vmatpush.bf16.msrb.mxu2 %v1425_v58  ;;  %v1654_v30 = vld [vmem:[#allocation2 + $0x264] sm:$0xf]  ;;  %v1502_v33 = vld [vmem:[#allocation2 + $0x370] sm:$0xf0]  ;;  %v1249_v35 = vor.u32 %v1622_v27, %v1246_v29  ;;  %v1605_v26 = vld [vmem:[#allocation2 + $0xd4] sm:$0xf0] }
  0x2f   :  { %909 = vmatpush.bf16.msrb.mxu3 %v1553_v62  ;;  %v1686_v32 = vld [vmem:[#allocation2 + $0x364] sm:$0xf]  ;;  %v1377_v36 = vor.u32 %v1654_v30, %v1374_v31  ;;  %v1102_v38 = vld [vmem:[#allocation2 + $0x50] sm:$0xf0]  ;;  %v1300_v27 = vld [vmem:[#allocation2 + $0x1c8] sm:$0xf] }
  0x30   :  { %871 = vmatpush.bf16.msrb.mxu0 %v1153_v8  ;;  %v1586_v37 = vld [vmem:[#allocation2 + $0x44] sm:$0xf]  ;;  %v1505_v40 = vor.u32 %v1686_v32, %v1502_v33  ;;  %v1230_v41 = vld [vmem:[#allocation2 + $0x150] sm:$0xf0]  ;;  %v1188_v8 = vld [vmem:[#allocation2 + $0xe8] sm:$0xf] }
  0x31   :  { %884 = vmatpush.bf16.msrb.mxu1 %v1281_v9  ;;  %v1618_v39 = vld [vmem:[#allocation2 + $0x144] sm:$0xf]  ;;  %v1358_v43 = vld [vmem:[#allocation2 + $0x250] sm:$0xf0]  ;;  %v1105_v46 = vor.u32 %v1586_v37, %v1102_v38  ;;  %v1609_v9 = vld [vmem:[#allocation2 + $0xf4] sm:$0xf0] }
  0x32   :  { %897 = vmatpush.bf16.msrb.mxu2 %v1409_v10  ;;  %v1650_v42 = vld [vmem:[#allocation2 + $0x244] sm:$0xf]  ;;  %v1486_v45 = vld [vmem:[#allocation2 + $0x350] sm:$0xf0]  ;;  %v1233_v47 = vor.u32 %v1618_v39, %v1230_v41  ;;  %v1316_v10 = vld [vmem:[#allocation2 + $0x1e8] sm:$0xf] }
  0x33   :  { %910 = vmatpush.bf16.msrb.mxu3 %v1537_v16  ;;  %v1682_v44 = vld [vmem:[#allocation2 + $0x344] sm:$0xf]  ;;  %v1361_v48 = vor.u32 %v1650_v42, %v1358_v43  ;;  %v1086_v50 = vld [vmem:[#allocation2 + $0x30] sm:$0xf0]  ;;  %v1673_v16 = vld [vmem:[#allocation2 + $0x2f4] sm:$0xf0] }
  0x34   :  { %872 = vmatpush.bf16.msrb.mxu0 %v1137_v22  ;;  %v1582_v49 = vld [vmem:[#allocation2 + $0x24] sm:$0xf]  ;;  %v1489_v52 = vor.u32 %v1682_v44, %v1486_v45  ;;  %v1214_v53 = vld [vmem:[#allocation2 + $0x130] sm:$0xf0]  ;;  %v1189_v22 = vor.u32 %v1609_v9, %v1188_v8  ;;  %v1637_v29 = vld [vmem:[#allocation2 + $0x1d4] sm:$0xf0] }
  0x35   :  { %885 = vmatpush.bf16.msrb.mxu1 %v1265_v23  ;;  %v1614_v51 = vld [vmem:[#allocation2 + $0x124] sm:$0xf]  ;;  %v1342_v55 = vld [vmem:[#allocation2 + $0x230] sm:$0xf0]  ;;  %v1089_v58 = vor.u32 %v1582_v49, %v1086_v50  ;;  %v1317_v23 = vor.u32 %v1641_v12, %v1316_v10  ;;  %v1428_v30 = vld [vmem:[#allocation2 + $0x2c8] sm:$0xf] }
  0x36   :  { %898 = vmatpush.bf16.msrb.mxu2 %v1393_v24  ;;  %v1646_v54 = vld [vmem:[#allocation2 + $0x224] sm:$0xf]  ;;  %v1470_v57 = vld [vmem:[#allocation2 + $0x330] sm:$0xf0]  ;;  %v1217_v61 = vor.u32 %v1614_v51, %v1214_v53  ;;  %v1445_v24 = vor.u32 %v1673_v16, %v1444_v13  ;;  %v1669_v31 = vld [vmem:[#allocation2 + $0x2d4] sm:$0xf0] }
  0x37   :  { %911 = vmatpush.bf16.msrb.mxu3 %v1521_v28  ;;  %v1678_v56 = vld [vmem:[#allocation2 + $0x324] sm:$0xf]  ;;  %v1070_v60 = vld [vmem:[#allocation2 + $0x10] sm:$0xf0]  ;;  %v1345_v62 = vor.u32 %v1646_v54, %v1342_v55  ;;  %v1573_v28 = vor.u32 %v1705_v20, %v1572_v19  ;;  %v1556_v32 = vld [vmem:[#allocation2 + $0x3c8] sm:$0xf] }
  0x38   :  { %873 = vmatpush.bf16.msrb.mxu0 %v1121_v34  ;;  %v1578_v59 = vld [vmem:[#allocation2 + $0x4] sm:$0xf]  ;;  %v1198_v0 = vld [vmem:[#allocation2 + $0x110] sm:$0xf0]  ;;  %v1473_v3 = vor.u32 %v1678_v56, %v1470_v57  ;;  %v1701_v33 = vld [vmem:[#allocation2 + $0x3d4] sm:$0xf0]  ;;  %v1173_v34 = vor.u32 %v1605_v26, %v1172_v25 }
  0x39   :  { %886 = vmatpush.bf16.msrb.mxu1 %v1249_v35  ;;  %v1610_v63 = vld [vmem:[#allocation2 + $0x104] sm:$0xf]  ;;  %v1326_v4 = vld [vmem:[#allocation2 + $0x210] sm:$0xf0]  ;;  %v1073_v11 = vor.u32 %v1578_v59, %v1070_v60  ;;  %v1301_v35 = vor.u32 %v1637_v29, %v1300_v27  ;;  %v1156_v37 = vld [vmem:[#allocation2 + $0xa8] sm:$0xf] }
  0x3a   :  { %899 = vmatpush.bf16.msrb.mxu2 %v1377_v36  ;;  %v1642_v2 = vld [vmem:[#allocation2 + $0x204] sm:$0xf]  ;;  %v1454_v7 = vld [vmem:[#allocation2 + $0x310] sm:$0xf0]  ;;  %v1201_v17 = vor.u32 %v1610_v63, %v1198_v0  ;;  %v1429_v36 = vor.u32 %v1669_v31, %v1428_v30  ;;  %v1601_v38 = vld [vmem:[#allocation2 + $0xb4] sm:$0xf0] }
  0x3b   :  { %912 = vmatpush.bf16.msrb.mxu3 %v1505_v40  ;;  %v1674_v6 = vld [vmem:[#allocation2 + $0x304] sm:$0xf]  ;;  %v1329_v18 = vor.u32 %v1642_v2, %v1326_v4  ;;  %v1284_v39 = vld [vmem:[#allocation2 + $0x1a8] sm:$0xf]  ;;  %v1557_v40 = vor.u32 %v1701_v33, %v1556_v32  ;;  %v1633_v41 = vld [vmem:[#allocation2 + $0x1b4] sm:$0xf0] }
  0x3c   :  { %874 = vmatpush.bf16.msrb.mxu0 %v1105_v46  ;;  %v1457_v21 = vor.u32 %v1674_v6, %v1454_v7  ;;  %v1412_v42 = vld [vmem:[#allocation2 + $0x2a8] sm:$0xf]  ;;  %v1665_v43 = vld [vmem:[#allocation2 + $0x2b4] sm:$0xf0]  ;;  %v1157_v46 = vor.u32 %v1601_v38, %v1156_v37 }
  0x3d   :  { %887 = vmatpush.bf16.msrb.mxu1 %v1233_v47  ;;  %v1540_v44 = vld [vmem:[#allocation2 + $0x3a8] sm:$0xf]  ;;  %v1697_v45 = vld [vmem:[#allocation2 + $0x3b4] sm:$0xf0]  ;;  %v1285_v47 = vor.u32 %v1633_v41, %v1284_v39 }
  0x3e   :  { %900 = vmatpush.bf16.msrb.mxu2 %v1361_v48  ;;  %v1413_v48 = vor.u32 %v1665_v43, %v1412_v42  ;;  %v1140_v49 = vld [vmem:[#allocation2 + $0x88] sm:$0xf]  ;;  %v1597_v50 = vld [vmem:[#allocation2 + $0x94] sm:$0xf0] }
  0x3f   :  { %913 = vmatpush.bf16.msrb.mxu3 %v1489_v52  ;;  %v1268_v51 = vld [vmem:[#allocation2 + $0x188] sm:$0xf]  ;;  %v1541_v52 = vor.u32 %v1697_v45, %v1540_v44  ;;  %v1629_v53 = vld [vmem:[#allocation2 + $0x194] sm:$0xf0] }
  0x40   :  { %875 = vmatpush.bf16.msrb.mxu0 %v1089_v58  ;;  %v1396_v54 = vld [vmem:[#allocation2 + $0x288] sm:$0xf]  ;;  %v1661_v55 = vld [vmem:[#allocation2 + $0x294] sm:$0xf0]  ;;  %v1141_v58 = vor.u32 %v1597_v50, %v1140_v49  ;;  %v1269_v59 = vor.u32 %v1629_v53, %v1268_v51  ;;  %v1318_v50 = vld [vmem:[#allocation2 + $0x1f8] sm:$0xf0] }
  0x41   :  { %888 = vmatpush.bf16.msrb.mxu1 %v1217_v61  ;;  %v1524_v56 = vld [vmem:[#allocation2 + $0x388] sm:$0xf]  ;;  %v1693_v57 = vld [vmem:[#allocation2 + $0x394] sm:$0xf0]  ;;  %v1397_v60 = vor.u32 %v1661_v55, %v1396_v54  ;;  %v1671_v51 = vld [vmem:[#allocation2 + $0x2ec] sm:$0xf] }
  0x42   :  { %901 = vmatpush.bf16.msrb.mxu2 %v1345_v62  ;;  %v1124_v61 = vld [vmem:[#allocation2 + $0x68] sm:$0xf]  ;;  %v1593_v62 = vld [vmem:[#allocation2 + $0x74] sm:$0xf0]  ;;  %v1525_v0 = vor.u32 %v1693_v57, %v1524_v56  ;;  %v1703_v55 = vld [vmem:[#allocation2 + $0x3ec] sm:$0xf] }
  0x43   :  { %914 = vmatpush.bf16.msrb.mxu3 %v1473_v3  ;;  %v1252_v63 = vld [vmem:[#allocation2 + $0x168] sm:$0xf]  ;;  %v1625_v2 = vld [vmem:[#allocation2 + $0x174] sm:$0xf0]  ;;  %v1125_v8 = vor.u32 %v1593_v62, %v1124_v61  ;;  %v1574_v56 = vld [vmem:[#allocation2 + $0x3f8] sm:$0xf0] }
  0x44   :  { %876 = vmatpush.bf16.msrb.mxu0 %v1073_v11  ;;  %v1380_v3 = vld [vmem:[#allocation2 + $0x268] sm:$0xf]  ;;  %v1657_v4 = vld [vmem:[#allocation2 + $0x274] sm:$0xf0]  ;;  %v1253_v9 = vor.u32 %v1625_v2, %v1252_v63  ;;  %v1603_v61 = vld [vmem:[#allocation2 + $0xcc] sm:$0xf] }
  0x45   :  { %889 = vmatpush.bf16.msrb.mxu1 %v1201_v17  ;;  %v1508_v6 = vld [vmem:[#allocation2 + $0x368] sm:$0xf]  ;;  %v1689_v7 = vld [vmem:[#allocation2 + $0x374] sm:$0xf0]  ;;  %v1381_v10 = vor.u32 %v1657_v4, %v1380_v3  ;;  %v1174_v62 = vld [vmem:[#allocation2 + $0xd8] sm:$0xf0] }
  0x46   :  { %902 = vmatpush.bf16.msrb.mxu2 %v1329_v18  ;;  %v1108_v11 = vld [vmem:[#allocation2 + $0x48] sm:$0xf]  ;;  %v1589_v12 = vld [vmem:[#allocation2 + $0x54] sm:$0xf0]  ;;  %v1509_v16 = vor.u32 %v1689_v7, %v1508_v6  ;;  %v1635_v63 = vld [vmem:[#allocation2 + $0x1cc] sm:$0xf] }
  0x47   :  { %915 = vmatpush.bf16.msrb.mxu3 %v1457_v21  ;;  %877 = vmatmul.bf16.vlgmr.msrb.gmra.mxu0 %v1777_v14  ;;  %v1236_v13 = vld [vmem:[#allocation2 + $0x148] sm:$0xf]  ;;  %v1621_v17 = vld [vmem:[#allocation2 + $0x154] sm:$0xf0]  ;;  %v1302_v2 = vld [vmem:[#allocation2 + $0x1d8] sm:$0xf0] }
  0x48   :  { %921 = vmatpush.bf16.msra.mxu0 %v1189_v22  ;;  %890 = vmatmul.bf16.vlgmr.msrb.gmra.mxu1 %v1779_v15  ;;  %v1364_v18 = vld [vmem:[#allocation2 + $0x248] sm:$0xf]  ;;  %v1653_v19 = vld [vmem:[#allocation2 + $0x254] sm:$0xf0]  ;;  %v1109_v22 = vor.u32 %v1589_v12, %v1108_v11  ;;  %v1667_v3 = vld [vmem:[#allocation2 + $0x2cc] sm:$0xf] }
  0x49   :  { %934 = vmatpush.bf16.msra.mxu1 %v1317_v23  ;;  %903 = vmatmul.bf16.vlgmr.msrb.gmra.mxu2 %v1769_v1  ;;  %v1492_v20 = vld [vmem:[#allocation2 + $0x348] sm:$0xf]  ;;  %v1685_v21 = vld [vmem:[#allocation2 + $0x354] sm:$0xf0]  ;;  %v1237_v23 = vor.u32 %v1621_v17, %v1236_v13  ;;  %v1430_v4 = vld [vmem:[#allocation2 + $0x2d8] sm:$0xf0] }
  0x4a   :  { %947 = vmatpush.bf16.msra.mxu2 %v1445_v24  ;;  %916 = vmatmul.bf16.vlgmr.msrb.gmra.mxu3 %v1774_v5  ;;  %v1365_v24 = vor.u32 %v1653_v19, %v1364_v18  ;;  %v1092_v25 = vld [vmem:[#allocation2 + $0x28] sm:$0xf]  ;;  %v1585_v26 = vld [vmem:[#allocation2 + $0x34] sm:$0xf0]  ;;  %v1699_v6 = vld [vmem:[#allocation2 + $0x3cc] sm:$0xf] }
  0x4b   :  { %960 = vmatpush.bf16.msra.mxu3 %v1573_v28  ;;  %v1220_v27 = vld [vmem:[#allocation2 + $0x128] sm:$0xf]  ;;  %v1493_v28 = vor.u32 %v1685_v21, %v1492_v20  ;;  %v1617_v29 = vld [vmem:[#allocation2 + $0x134] sm:$0xf0]  ;;  %v1558_v7 = vld [vmem:[#allocation2 + $0x3d8] sm:$0xf0] }
  0x4c   :  { %922 = vmatpush.bf16.msra.mxu0 %v1173_v34  ;;  %v1348_v30 = vld [vmem:[#allocation2 + $0x228] sm:$0xf]  ;;  %v1649_v31 = vld [vmem:[#allocation2 + $0x234] sm:$0xf0]  ;;  %v1093_v34 = vor.u32 %v1585_v26, %v1092_v25  ;;  %v1221_v37 = vor.u32 %v1617_v29, %v1220_v27  ;;  %v1599_v11 = vld [vmem:[#allocation2 + $0xac] sm:$0xf] }
  0x4d   :  { %935 = vmatpush.bf16.msra.mxu1 %v1301_v35  ;;  %v1476_v32 = vld [vmem:[#allocation2 + $0x328] sm:$0xf]  ;;  %v1681_v33 = vld [vmem:[#allocation2 + $0x334] sm:$0xf0]  ;;  %v1349_v38 = vor.u32 %v1649_v31, %v1348_v30  ;;  %v1158_v12 = vld [vmem:[#allocation2 + $0xb8] sm:$0xf0] }
  0x4e   :  { %948 = vmatpush.bf16.msra.mxu2 %v1429_v36  ;;  %v1076_v35 = vld [vmem:[#allocation2 + $0x8] sm:$0xf]  ;;  %v1581_v36 = vld [vmem:[#allocation2 + $0x14] sm:$0xf0]  ;;  %v1477_v42 = vor.u32 %v1681_v33, %v1476_v32  ;;  %v1631_v13 = vld [vmem:[#allocation2 + $0x1ac] sm:$0xf] }
  0x4f   :  { %961 = vmatpush.bf16.msra.mxu3 %v1557_v40  ;;  %v1204_v39 = vld [vmem:[#allocation2 + $0x108] sm:$0xf]  ;;  %v1613_v40 = vld [vmem:[#allocation2 + $0x114] sm:$0xf0]  ;;  %v1077_v49 = vor.u32 %v1581_v36, %v1076_v35  ;;  %v1286_v17 = vld [vmem:[#allocation2 + $0x1b8] sm:$0xf0] }
  0x50   :  { %923 = vmatpush.bf16.msra.mxu0 %v1157_v46  ;;  %v1332_v41 = vld [vmem:[#allocation2 + $0x208] sm:$0xf]  ;;  %v1645_v43 = vld [vmem:[#allocation2 + $0x214] sm:$0xf0]  ;;  %v1607_v46 = vld [vmem:[#allocation2 + $0xec] sm:$0xf]  ;;  %v1205_v53 = vor.u32 %v1613_v40, %v1204_v39 }
  0x51   :  { %936 = vmatpush.bf16.msra.mxu1 %v1285_v47  ;;  %v1460_v44 = vld [vmem:[#allocation2 + $0x308] sm:$0xf]  ;;  %v1677_v45 = vld [vmem:[#allocation2 + $0x314] sm:$0xf0]  ;;  %v1190_v47 = vld [vmem:[#allocation2 + $0xf8] sm:$0xf0]  ;;  %v1333_v54 = vor.u32 %v1645_v43, %v1332_v41 }
  0x52   :  { %949 = vmatpush.bf16.msra.mxu2 %v1413_v48  ;;  %v1639_v48 = vld [vmem:[#allocation2 + $0x1ec] sm:$0xf]  ;;  %v1461_v57 = vor.u32 %v1677_v45, %v1460_v44  ;;  %v1414_v19 = vld [vmem:[#allocation2 + $0x2b8] sm:$0xf0] }
  0x53   :  { %962 = vmatpush.bf16.msra.mxu3 %v1541_v52  ;;  %v1446_v52 = vld [vmem:[#allocation2 + $0x2f8] sm:$0xf0]  ;;  %v1663_v18 = vld [vmem:[#allocation2 + $0x2ac] sm:$0xf] }
  0x54   :  { %924 = vmatpush.bf16.msra.mxu0 %v1141_v58  ;;  %v1193_v58 = vor.u32 %v1607_v46, %v1190_v47  ;;  %v1695_v20 = vld [vmem:[#allocation2 + $0x3ac] sm:$0xf]  ;;  %v1542_v21 = vld [vmem:[#allocation2 + $0x3b8] sm:$0xf0] }
  0x55   :  { %937 = vmatpush.bf16.msra.mxu1 %v1269_v59  ;;  %v1321_v59 = vor.u32 %v1639_v48, %v1318_v50  ;;  %v1595_v25 = vld [vmem:[#allocation2 + $0x8c] sm:$0xf]  ;;  %v1142_v26 = vld [vmem:[#allocation2 + $0x98] sm:$0xf0] }
  0x56   :  { %950 = vmatpush.bf16.msra.mxu2 %v1397_v60  ;;  %v1449_v60 = vor.u32 %v1671_v51, %v1446_v52  ;;  %v1627_v27 = vld [vmem:[#allocation2 + $0x18c] sm:$0xf]  ;;  %v1270_v29 = vld [vmem:[#allocation2 + $0x198] sm:$0xf0] }
  0x57   :  { %963 = vmatpush.bf16.msra.mxu3 %v1525_v0  ;;  %v1577_v0 = vor.u32 %v1703_v55, %v1574_v56  ;;  %v1659_v30 = vld [vmem:[#allocation2 + $0x28c] sm:$0xf]  ;;  %v1398_v31 = vld [vmem:[#allocation2 + $0x298] sm:$0xf0]  ;;  %v1273_v35 = vor.u32 %v1627_v27, %v1270_v29 }
  0x58   :  { %925 = vmatpush.bf16.msra.mxu0 %v1125_v8  ;;  %v1177_v8 = vor.u32 %v1603_v61, %v1174_v62  ;;  %v1691_v32 = vld [vmem:[#allocation2 + $0x38c] sm:$0xf]  ;;  %v1526_v33 = vld [vmem:[#allocation2 + $0x398] sm:$0xf0]  ;;  %v1401_v36 = vor.u32 %v1659_v30, %v1398_v31 }
  0x59   :  { %938 = vmatpush.bf16.msra.mxu1 %v1253_v9  ;;  %v1305_v9 = vor.u32 %v1635_v63, %v1302_v2  ;;  %v1623_v39 = vld [vmem:[#allocation2 + $0x16c] sm:$0xf]  ;;  %v1529_v40 = vor.u32 %v1691_v32, %v1526_v33  ;;  %v1254_v41 = vld [vmem:[#allocation2 + $0x178] sm:$0xf0] }
  0x5a   :  { %951 = vmatpush.bf16.msra.mxu2 %v1381_v10  ;;  %v1433_v10 = vor.u32 %v1667_v3, %v1430_v4  ;;  %v1382_v43 = vld [vmem:[#allocation2 + $0x278] sm:$0xf0]  ;;  %v1687_v44 = vld [vmem:[#allocation2 + $0x36c] sm:$0xf]  ;;  %v1257_v47 = vor.u32 %v1623_v39, %v1254_v41 }
  0x5b   :  { %964 = vmatpush.bf16.msra.mxu3 %v1509_v16  ;;  %v1561_v16 = vor.u32 %v1699_v6, %v1558_v7  ;;  %v1510_v45 = vld [vmem:[#allocation2 + $0x378] sm:$0xf0]  ;;  %v1619_v51 = vld [vmem:[#allocation2 + $0x14c] sm:$0xf] }
  0x5c   :  { %926 = vmatpush.bf16.msra.mxu0 %v1109_v22  ;;  %v1161_v22 = vor.u32 %v1599_v11, %v1158_v12  ;;  %v1110_v50 = vld [vmem:[#allocation2 + $0x58] sm:$0xf0]  ;;  %v1513_v52 = vor.u32 %v1687_v44, %v1510_v45  ;;  %v1683_v56 = vld [vmem:[#allocation2 + $0x34c] sm:$0xf] }
  0x5d   :  { %939 = vmatpush.bf16.msra.mxu1 %v1237_v23  ;;  %v1289_v23 = vor.u32 %v1631_v13, %v1286_v17  ;;  %v1366_v55 = vld [vmem:[#allocation2 + $0x258] sm:$0xf0]  ;;  %v1583_v61 = vld [vmem:[#allocation2 + $0x2c] sm:$0xf] }
  0x5e   :  { %952 = vmatpush.bf16.msra.mxu2 %v1365_v24  ;;  %v1417_v24 = vor.u32 %v1663_v18, %v1414_v19  ;;  %v1094_v62 = vld [vmem:[#allocation2 + $0x38] sm:$0xf0]  ;;  %v1615_v63 = vld [vmem:[#allocation2 + $0x12c] sm:$0xf] }
  0x5f   :  { %965 = vmatpush.bf16.msra.mxu3 %v1493_v28  ;;  %v1545_v28 = vor.u32 %v1695_v20, %v1542_v21  ;;  %v1222_v2 = vld [vmem:[#allocation2 + $0x138] sm:$0xf0]  ;;  %v1647_v3 = vld [vmem:[#allocation2 + $0x22c] sm:$0xf] }
  0x60   :  { %927 = vmatpush.bf16.msra.mxu0 %v1093_v34  ;;  %v1145_v34 = vor.u32 %v1595_v25, %v1142_v26  ;;  %v1350_v4 = vld [vmem:[#allocation2 + $0x238] sm:$0xf0]  ;;  %v1679_v6 = vld [vmem:[#allocation2 + $0x32c] sm:$0xf] }
  0x61   :  { %940 = vmatpush.bf16.msra.mxu1 %v1221_v37  ;;  %v1591_v37 = vld [vmem:[#allocation2 + $0x6c] sm:$0xf]  ;;  %v1478_v7 = vld [vmem:[#allocation2 + $0x338] sm:$0xf0] }
  0x62   :  { %953 = vmatpush.bf16.msra.mxu2 %v1349_v38  ;;  %v1126_v38 = vld [vmem:[#allocation2 + $0x78] sm:$0xf0]  ;;  %v1579_v11 = vld [vmem:[#allocation2 + $0xc] sm:$0xf] }
  0x63   :  { %966 = vmatpush.bf16.msra.mxu3 %v1477_v42  ;;  %v1655_v42 = vld [vmem:[#allocation2 + $0x26c] sm:$0xf]  ;;  %v1129_v46 = vor.u32 %v1591_v37, %v1126_v38  ;;  %v1078_v12 = vld [vmem:[#allocation2 + $0x18] sm:$0xf0] }
  0x64   :  { %928 = vmatpush.bf16.msra.mxu0 %v1077_v49  ;;  %v1385_v48 = vor.u32 %v1655_v42, %v1382_v43  ;;  %v1587_v49 = vld [vmem:[#allocation2 + $0x4c] sm:$0xf]  ;;  %v1206_v17 = vld [vmem:[#allocation2 + $0x118] sm:$0xf0] }
  0x65   :  { %941 = vmatpush.bf16.msra.mxu1 %v1205_v53  ;;  %v1238_v53 = vld [vmem:[#allocation2 + $0x158] sm:$0xf0]  ;;  %v1611_v13 = vld [vmem:[#allocation2 + $0x10c] sm:$0xf] }
  0x66   :  { %954 = vmatpush.bf16.msra.mxu2 %v1333_v54  ;;  %v1651_v54 = vld [vmem:[#allocation2 + $0x24c] sm:$0xf]  ;;  %v1334_v19 = vld [vmem:[#allocation2 + $0x218] sm:$0xf0] }
  0x67   :  { %967 = vmatpush.bf16.msra.mxu3 %v1461_v57  ;;  %929 = vmatmul.bf16.vlgmr.msra.gmra.mxu0 %v1777_v14  ;;  %v1494_v57 = vld [vmem:[#allocation2 + $0x358] sm:$0xf0]  ;;  %v1643_v18 = vld [vmem:[#allocation2 + $0x20c] sm:$0xf] }
  0x68   :  { %973 = vmatpush.bf16.msrb.mxu0 %v1193_v58  ;;  %942 = vmatmul.bf16.vlgmr.msra.gmra.mxu1 %v1779_v15  ;;  %v1113_v58 = vor.u32 %v1587_v49, %v1110_v50  ;;  %v1675_v20 = vld [vmem:[#allocation2 + $0x30c] sm:$0xf]  ;;  %v1462_v21 = vld [vmem:[#allocation2 + $0x318] sm:$0xf0] }
  0x69   :  { %986 = vmatpush.bf16.msrb.mxu1 %v1321_v59  ;;  %955 = vmatmul.bf16.vlgmr.msra.gmra.mxu2 %v1769_v1  ;;  %v1241_v59 = vor.u32 %v1619_v51, %v1238_v53  ;;  %v1465_v25 = vor.u32 %v1675_v20, %v1462_v21 }
  0x6a   :  { %999 = vmatpush.bf16.msrb.mxu2 %v1449_v60  ;;  %968 = vmatmul.bf16.vlgmr.msra.gmra.mxu3 %v1774_v5  ;;  %v1369_v60 = vor.u32 %v1651_v54, %v1366_v55 }
  0x6b   :  { %1012 = vmatpush.bf16.msrb.mxu3 %v1577_v0  ;;  %v1497_v0 = vor.u32 %v1683_v56, %v1494_v57 }
  0x6c   :  { %974 = vmatpush.bf16.msrb.mxu0 %v1177_v8  ;;  %v1097_v8 = vor.u32 %v1583_v61, %v1094_v62 }
  0x6d   :  { %987 = vmatpush.bf16.msrb.mxu1 %v1305_v9  ;;  %v1225_v9 = vor.u32 %v1615_v63, %v1222_v2 }
  0x6e   :  { %1000 = vmatpush.bf16.msrb.mxu2 %v1433_v10  ;;  %v1353_v10 = vor.u32 %v1647_v3, %v1350_v4 }
  0x6f   :  { %1013 = vmatpush.bf16.msrb.mxu3 %v1561_v16  ;;  %v1481_v16 = vor.u32 %v1679_v6, %v1478_v7 }
  0x70   :  { %975 = vmatpush.bf16.msrb.mxu0 %v1161_v22  ;;  %v1081_v22 = vor.u32 %v1579_v11, %v1078_v12 }
  0x71   :  { %988 = vmatpush.bf16.msrb.mxu1 %v1289_v23  ;;  %v1209_v23 = vor.u32 %v1611_v13, %v1206_v17 }
  0x72   :  { %1001 = vmatpush.bf16.msrb.mxu2 %v1417_v24  ;;  %v1337_v24 = vor.u32 %v1643_v18, %v1334_v19 }
  0x73   :  { %1014 = vmatpush.bf16.msrb.mxu3 %v1545_v28 }
  0x74   :  { %976 = vmatpush.bf16.msrb.mxu0 %v1145_v34 }
  0x75   :  { %989 = vmatpush.bf16.msrb.mxu1 %v1273_v35 }
  0x76   :  { %1002 = vmatpush.bf16.msrb.mxu2 %v1401_v36 }
  0x77   :  { %1015 = vmatpush.bf16.msrb.mxu3 %v1529_v40 }
  0x78   :  { %977 = vmatpush.bf16.msrb.mxu0 %v1129_v46 }
  0x79   :  { %990 = vmatpush.bf16.msrb.mxu1 %v1257_v47 }
  0x7a   :  { %1003 = vmatpush.bf16.msrb.mxu2 %v1385_v48 }
  0x7b   :  { %1016 = vmatpush.bf16.msrb.mxu3 %v1513_v52 }
  0x7c   :  { %978 = vmatpush.bf16.msrb.mxu0 %v1113_v58 }
  0x7d   :  { %991 = vmatpush.bf16.msrb.mxu1 %v1241_v59 }
  0x7e   :  { %1004 = vmatpush.bf16.msrb.mxu2 %v1369_v60 }
  0x7f   :  { %1017 = vmatpush.bf16.msrb.mxu3 %v1497_v0 }
  0x80   :  { %979 = vmatpush.bf16.msrb.mxu0 %v1097_v8 }
  0x81   :  { %992 = vmatpush.bf16.msrb.mxu1 %v1225_v9 }
  0x82   :  { %1005 = vmatpush.bf16.msrb.mxu2 %v1353_v10 }
  0x83   :  { %1018 = vmatpush.bf16.msrb.mxu3 %v1481_v16 }
  0x84   :  { %980 = vmatpush.bf16.msrb.mxu0 %v1081_v22 }
  0x85   :  { %993 = vmatpush.bf16.msrb.mxu1 %v1209_v23 }
  0x86   :  { %1006 = vmatpush.bf16.msrb.mxu2 %v1337_v24 }
  0x87   :  { %1019 = vmatpush.bf16.msrb.mxu3 %v1465_v25  ;;  %981 = vmatmul.bf16.vlgmr.msrb.gmra.mxu0 %v1777_v14  ;;  %v1025_v14 = vld [vmem:[%s1810_s2] sm:$0xf] }
  0x88   :  { %994 = vmatmul.bf16.vlgmr.msrb.gmra.mxu1 %v1779_v15  ;;  %v1028_v44 = vperm.slane %v1025_v14, 1  ;;  %v1029_v8 = vperm.slane %v1025_v14, 2  ;;  %v1030_v17 = vperm.slane %v1025_v14, 3 }
  0x89   :  { %1007 = vmatmul.bf16.vlgmr.msrb.gmra.mxu2 %v1769_v1  ;;  %v1027_v1 = vperm.slane %v1025_v14, 0 }
  0x8a   :  { %1020 = vmatmul.bf16.vlgmr.msrb.gmra.mxu3 %v1774_v5  ;;  %v1039_v5 = vld [vmem:[%s1811_s3] sm:$0xf] }
  0x8b   :  { %v1041_v41 = vperm.slane %v1039_v5, 0  ;;  %v1042_v46 = vperm.slane %v1039_v5, 1  ;;  %v1043_v12 = vperm.slane %v1039_v5, 2  ;;  %v1044_v21 = vperm.slane %v1039_v5, 3 }
  0xa8   :  { %v826_v26 = vpop.f32.mrf.mxu0 }
  0xa9   :  { %v839_v27 = vpop.f32.mrf.mxu1 }
  0xaa   :  { %v840_v34 = vadd.f32 %v839_v27, %v826_v26 }
  0xac   :  { %v852_v28 = vpop.f32.mrf.mxu2 }
  0xad   :  { %v865_v29 = vpop.f32.mrf.mxu3  ;;  %v853_v35 = vadd.f32 %v852_v28, %v840_v34 }
  0xaf   :  { %v866_v37 = vadd.f32 %v865_v29, %v853_v35 }
  0xb0   :  { %v828_v30 = vpop.f32.mrf.mxu0 }
  0xb1   :  { %v841_v31 = vpop.f32.mrf.mxu1  ;;  %v1035_v40 = vmul.f32 %v1027_v1, %v866_v37 }
  0xb3   :  { %v1049_v49 = vadd.f32 %v1041_v41, %v1035_v40 }
  0xb4   :  { %v854_v32 = vpop.f32.mrf.mxu2 }
  0xb5   :  { %v867_v33 = vpop.f32.mrf.mxu3  ;;  %v1053_v53 = vmax.f32 %v1049_v49, 0.0 }
  0xc4   :  { %v878_v36 = vpop.f32.mrf.mxu0 }
  0xc5   :  { %v891_v15 = vpop.f32.mrf.mxu1 }
  0xc6   :  { %v892_v38 = vadd.f32 %v891_v15, %v878_v36 }
  0xcc   :  { %v904_v39 = vpop.f32.mrf.mxu2  ;;  %v880_v47 = vpop.f32.mrf.mxu0 }
  0xcd   :  { %v905_v42 = vadd.f32 %v904_v39, %v892_v38  ;;  %v917_v43 = vpop.f32.mrf.mxu3  ;;  %v893_v48 = vpop.f32.mrf.mxu1 }
  0xcf   :  { %v918_v45 = vadd.f32 %v917_v43, %v905_v42 }
  0xd1   :  { %v1036_v50 = vmul.f32 %v1028_v44, %v918_v45 }
  0xd3   :  { %v1050_v51 = vadd.f32 %v1042_v46, %v1036_v50 }
  0xd4   :  { %v906_v52 = vpop.f32.mrf.mxu2 }
  0xd5   :  { %v1054_v54 = vmax.f32 %v1050_v51, 0.0  ;;  %v919_v55 = vpop.f32.mrf.mxu3 }
  0xd7   :  { %v1057_v56 = vpack.c.bf16 %v1054_v54, %v1053_v53 }
  0xd9   :  { %1059 = vst [vmem:[%s1812_s4] sm:$0xff] %v1057_v56 }
  0xe4   :  { %v930_v57 = vpop.f32.mrf.mxu0 }
  0xe5   :  { %v943_v58 = vpop.f32.mrf.mxu1 }
  0xe6   :  { %v944_v2 = vadd.f32 %v943_v58, %v930_v57 }
  0xec   :  { %v956_v59 = vpop.f32.mrf.mxu2  ;;  %v932_v61 = vpop.f32.mrf.mxu0 }
  0xed   :  { %v969_v60 = vpop.f32.mrf.mxu3  ;;  %v945_v62 = vpop.f32.mrf.mxu1  ;;  %v957_v3 = vadd.f32 %v956_v59, %v944_v2 }
  0xef   :  { %v970_v7 = vadd.f32 %v969_v60, %v957_v3 }
  0xf1   :  { %v1037_v11 = vmul.f32 %v1029_v8, %v970_v7 }
  0xf3   :  { %v1051_v22 = vadd.f32 %v1043_v12, %v1037_v11 }
  0xf4   :  { %v958_v63 = vpop.f32.mrf.mxu2 }
  0xf5   :  { %v971_v0 = vpop.f32.mrf.mxu3  ;;  %v1055_v26 = vmax.f32 %v1051_v22, 0.0 }
 0x104   :  { %v982_v4 = vpop.f32.mrf.mxu0 }
 0x105   :  { %v995_v6 = vpop.f32.mrf.mxu1 }
 0x106   :  { %v996_v9 = vadd.f32 %v995_v6, %v982_v4 }
 0x10c   :  { %v1008_v10 = vpop.f32.mrf.mxu2  ;;  %v984_v18 = vpop.f32.mrf.mxu0 }
 0x10d   :  { %v1009_v13 = vadd.f32 %v1008_v10, %v996_v9  ;;  %v1021_v16 = vpop.f32.mrf.mxu3  ;;  %v997_v19 = vpop.f32.mrf.mxu1 }
 0x10f   :  { %v1022_v20 = vadd.f32 %v1021_v16, %v1009_v13 }
 0x111   :  { %v1038_v23 = vmul.f32 %v1030_v17, %v1022_v20 }
 0x113   :  { %v1052_v24 = vadd.f32 %v1044_v21, %v1038_v23 }
 0x114   :  { %v1010_v25 = vpop.f32.mrf.mxu2 }
 0x115   :  { %v1056_v27 = vmax.f32 %v1052_v24, 0.0  ;;  %v1023_v28 = vpop.f32.mrf.mxu3 }
 0x117   :  { %v1058_v29 = vpack.c.bf16 %v1056_v27, %v1055_v26 }
 0x119   :  { %1060 = vst [vmem:[%s1812_s4 + $0x8] sm:$0xff] %v1058_v29 }
 0x11a   :  { %1065 = vsyncpa [#allocation3], 1 }

// kernel: forward.11
= control target key start
LH: loop header
LB: loop body
LE: loop exit
PB: predicated region body
PF: predicated region fallthrough
CT: control target
= control target key end

     0   :  { %s343_s9 = smov 0   ;;  %s345_s10 = smov 0   ;;  %s367_s0 = inlined_call_operand.vmem [shape: f32[4,2], index: 0, kind: input, shape index: {}]   ;;  %s368_s1 = inlined_call_operand.vmem [shape: bf16[4,2,128], index: 1, kind: input, shape index: {}]   ;;  %s369_s2 = inlined_call_operand.vmem [shape: f32[4,4,128], index: 2, kind: output, shape index: {}]  }
   0x1   :  { %s347_s11 = smov 0  }
   0x2 LB: > { %s24_s12 = sadd.s32 1, %s322_s10  ;;  %p274_p0 = scmp.ge.s32.totalorder %s326_s11, 1  ;;  %s326_s11 = sphi %s347_s11, %s12_s11   ;;  %s322_s10 = sphi %s345_s10, %s371_s10   ;;  %s318_s9 = sphi %s343_s9, %s370_s9  }
   0x3   : > { %p26_p1 = scmp.ge.s32.totalorder %s24_s12, 4  ;;  %p129_p2 = scmp.lt.s32.totalorder %s326_s11, 5 }
   0x5   : > { %s373_s12 = smov (%p26_p1, %s24_s12), 0  ;;  %p130_p3 = pnand %p274_p0, %p129_p2 }
   0x6   : > { %p154_p4 = scmp.lt.s32.totalorder (!%p130_p3), %s318_s9, 3 }
   0x7   : > { %133 = sbr.rel (%p130_p3) target bundleno = 145 (0x91), region = 28 }
   0xc   : > { %s375_s9 = smov (!%p154_p4, %s318_s9), 3  ;;  %vm174_vm0 = vcmask 1041408   ;;  %v167_v2 = vld [vmem:[%s367_s0] sm:$0xf]  ;;  %vm170_vm1 = vcmask 15360  }
   0xd   : > { %s159_s15 = scalar_lea.vmem %s368_s1, %s375_s9  ;;  %s275_s18 = sshll.u32 %s375_s9, 2 }
   0xe   : > { %v168_v0 = vld [vmem:[%s159_s15] sm:$0x1]  ;;  %s166_s21 = scalar_lea.vmem %s369_s2, %s275_s18 }
   0xf   : > { %v169_v1 = vunpack.c.l.bf16 %v168_v0 }
  0x11   : > { %276 = vmatpush.msk.msra.mxu0 %vm174_vm0, %v169_v1 }
  0x12   : > { %277 = vmatmul.msk.f32.vlgmr.msra.gmra.mxu0 %vm170_vm1, %v167_v2 }
  0x8f   : > { %v195_v3 = vpop.f32.mrf.mxu0 }
  0x90   : > { %198 = vst [vmem:[%s166_s21] sm:$0xf] %v195_v3 }
  0x91 PF: > { %s12_s11 = sadd.s32 1, %s326_s11   ;;  %s370_s9 = smov %s322_s10 }
  0x92   : > { %p9_p5 = scmp.ge.s32.totalorder %s12_s11, 6   ;;  %s371_s10 = smov %s373_s12 }
  0x94   :  { %11 = sbr.rel (!%p9_p5) target bundleno = 2 (0x2), region = 58 }

// kernel: forward.12
= control target key start
LH: loop header
LB: loop body
LE: loop exit
PB: predicated region body
PF: predicated region fallthrough
CT: control target
= control target key end

     0   :  { %s468_s9 = smov 0   ;;  %s470_s10 = smov 0   ;;  %s504_s0 = inlined_call_operand.vmem [shape: f32[4,2], index: 0, kind: input, shape index: {}]   ;;  %s505_s1 = inlined_call_operand.vmem [shape: f32[2,2,512], index: 1, kind: input, shape index: {}]   ;;  %s506_s2 = inlined_call_operand.vmem [shape: f32[2,4,512], index: 2, kind: output, shape index: {}]  }
   0x1   :  { %s472_s11 = smov 0  }
   0x2 LB: > { %s24_s12 = sadd.s32 1, %s447_s10  ;;  %p388_p0 = scmp.ge.s32.totalorder %s451_s11, 1  ;;  %s451_s11 = sphi %s472_s11, %s12_s11   ;;  %s447_s10 = sphi %s470_s10, %s508_s10   ;;  %s443_s9 = sphi %s468_s9, %s507_s9  }
   0x3   : > { %p26_p1 = scmp.ge.s32.totalorder %s24_s12, 2  ;;  %p133_p2 = scmp.lt.s32.totalorder %s451_s11, 3 }
   0x5   : > { %s510_s12 = smov (%p26_p1, %s24_s12), 0  ;;  %p134_p3 = pnand %p388_p0, %p133_p2 }
   0x6   : > { %p164_p4 = scmp.lt.s32.totalorder (!%p134_p3), %s443_s9, 1 }
   0x7   : > { %137 = sbr.rel (%p134_p3) target bundleno = 161 (0xa1), region = 28 }
   0xc   : > { %s512_s9 = smov (!%p164_p4, %s443_s9), 1  ;;  %vm195_vm0 = vcmask 1041408   ;;  %v183_v1 = vld [vmem:[%s504_s0] sm:$0xf]  ;;  %vm191_vm1 = vcmask 15360   ;;  %vm290_vm2 = vcmask 1043456  }
   0xd   : > { %s403_s13 = sshll.u32 %s512_s9, 3  ;;  %s404_s19 = sshll.u32 %s512_s9, 4 }
   0xe   : > { %s171_s16 = scalar_lea.vmem %s505_s1, %s403_s13  ;;  %s181_s22 = scalar_lea.vmem %s506_s2, %s404_s19 }
   0xf   : > { %v184_v0 = vld [vmem:[%s171_s16] sm:$0xff] }
  0x10   : > { %186 = vst [vmem:[#allocation1] ss:$4 sm:$0xff] %v184_v0 }
  0x17   : > { %v190_v2 = vld.sshfl [vmem:[#allocation1 + $0x18] sm:$0xff pattern:$0x73625140]  ;;  %v189_v3 = vld.sshfl [vmem:[#allocation1 + $0x10] sm:$0xff pattern:$0x73625140] }
  0x18   : > { %399 = vmatpush.msk.msra.mxu3 %vm195_vm0, %v190_v2  ;;  %397 = vmatpush.msk.msra.mxu2 %vm195_vm0, %v189_v3  ;;  %v188_v4 = vld.sshfl [vmem:[#allocation1 + $0x8] sm:$0xff pattern:$0x73625140]  ;;  %v187_v5 = vld.sshfl [vmem:[#allocation1] sm:$0xff pattern:$0x73625140] }
  0x19   : > { %400 = vmatmul.msk.f32.vlgmr.msra.gmra.mxu3 %vm191_vm1, %v183_v1  ;;  %398 = vmatmul.msk.f32.vlgmr.msra.gmra.mxu2 %vm191_vm1, %v183_v1 }
  0x1a   : > { %395 = vmatpush.msk.msra.mxu1 %vm195_vm0, %v188_v4  ;;  %393 = vmatpush.msk.msra.mxu0 %vm195_vm0, %v187_v5 }
  0x1b   : > { %396 = vmatmul.msk.f32.vlgmr.msra.gmra.mxu1 %vm191_vm1, %v183_v1  ;;  %394 = vmatmul.msk.f32.vlgmr.msra.gmra.mxu0 %vm191_vm1, %v183_v1 }
  0x98   : > { %v241_v6 = vpop.f32.mrf.mxu1  ;;  %v221_v7 = vpop.f32.mrf.mxu0 }
  0x99   : > { %v288_v8 = vrot.slane %v241_v6, 4 }
  0x9b   : > { %v291_v9 = vsel %vm290_vm2, %v221_v7, %v288_v8 }
  0x9c   : > { %v281_v10 = vpop.f32.mrf.mxu3  ;;  %295 = vst [vmem:[%s181_s22] sm:$0xff] %v291_v9  ;;  %v261_v11 = vpop.f32.mrf.mxu2 }
  0x9d   : > { %v289_v12 = vrot.slane %v281_v10, 4 }
  0x9f   : > { %v292_v13 = vsel %vm290_vm2, %v261_v11, %v289_v12 }
  0xa0   : > { %296 = vst [vmem:[%s181_s22 + $0x8] sm:$0xff] %v292_v13 }
  0xa1 PF: > { %s12_s11 = sadd.s32 1, %s451_s11   ;;  %s507_s9 = smov %s447_s10 }
  0xa2   : > { %p9_p5 = scmp.ge.s32.totalorder %s12_s11, 4   ;;  %s508_s10 = smov %s510_s12 }
  0xa4   :  { %11 = sbr.rel (!%p9_p5) target bundleno = 2 (0x2), region = 58 }

// kernel: forward.13
= control target key start
LH: loop header
LB: loop body
LE: loop exit
PB: predicated region body
PF: predicated region fallthrough
CT: control target
= control target key end

     0   :  { %vm507_vm0 = vcmask 48128   ;;  %s998_s3 = inlined_call_operand.vmem [shape: bf16[128,6], index: 3, kind: input, shape index: {}]   ;;  %s999_s2 = inlined_call_operand.vmem [shape: bf16[512,6], index: 2, kind: input, shape index: {}]   ;;  %s1000_s0 = inlined_call_operand.vmem [shape: bf16[32,512], index: 0, kind: input, shape index: {}]   ;;  %s1001_s1 = inlined_call_operand.vmem [shape: bf16[32,128], index: 1, kind: input, shape index: {}]   ;;  %s1002_s4 = inlined_call_operand.vmem [shape: f32[1,6], index: 4, kind: input, shape index: {}]   ;;  %s1003_s5 = inlined_call_operand.vmem [shape: f32[32,6], index: 5, kind: output, shape index: {}]  }
   0x1   :  { %v765_v0 = vld [vmem:[%s998_s3 + $0x38] sm:$0xff]  ;;  %v764_v4 = vld [vmem:[%s998_s3 + $0x30] sm:$0xff]  ;;  %v763_v8 = vld [vmem:[%s998_s3 + $0x28] sm:$0xff] }
   0x2   :  { %v731_v1 = vld [vmem:[%s999_s2 + $0x38] sm:$0xff]  ;;  %172 = vmatpush.bf16.msra.mxu0 %v765_v0  ;;  %v730_v5 = vld [vmem:[%s999_s2 + $0x30] sm:$0xff]  ;;  %v729_v9 = vld [vmem:[%s999_s2 + $0x28] sm:$0xff] }
   0x3   :  { %v739_v2 = vld [vmem:[%s999_s2 + $0x78] sm:$0xff]  ;;  %423 = vmatpush.bf16.msra.mxu1 %v731_v1  ;;  %v738_v6 = vld [vmem:[%s999_s2 + $0x70] sm:$0xff]  ;;  %v737_v10 = vld [vmem:[%s999_s2 + $0x68] sm:$0xff] }
   0x4   :  { %v747_v3 = vld [vmem:[%s999_s2 + $0xb8] sm:$0xff]  ;;  %442 = vmatpush.bf16.msra.mxu2 %v739_v2  ;;  %v746_v7 = vld [vmem:[%s999_s2 + $0xb0] sm:$0xff]  ;;  %v745_v11 = vld [vmem:[%s999_s2 + $0xa8] sm:$0xff] }
   0x5   :  { %461 = vmatpush.bf16.msra.mxu3 %v747_v3  ;;  %v762_v12 = vld [vmem:[%s998_s3 + $0x20] sm:$0xff]  ;;  %v761_v16 = vld [vmem:[%s998_s3 + $0x18] sm:$0xff]  ;;  %v760_v20 = vld [vmem:[%s998_s3 + $0x10] sm:$0xff] }
   0x6   :  { %173 = vmatpush.bf16.msra.mxu0 %v764_v4  ;;  %v728_v13 = vld [vmem:[%s999_s2 + $0x20] sm:$0xff]  ;;  %v727_v17 = vld [vmem:[%s999_s2 + $0x18] sm:$0xff]  ;;  %v726_v21 = vld [vmem:[%s999_s2 + $0x10] sm:$0xff] }
   0x7   :  { %424 = vmatpush.bf16.msra.mxu1 %v730_v5  ;;  %v736_v14 = vld [vmem:[%s999_s2 + $0x60] sm:$0xff]  ;;  %v735_v18 = vld [vmem:[%s999_s2 + $0x58] sm:$0xff]  ;;  %v734_v22 = vld [vmem:[%s999_s2 + $0x50] sm:$0xff] }
   0x8   :  { %443 = vmatpush.bf16.msra.mxu2 %v738_v6  ;;  %v744_v15 = vld [vmem:[%s999_s2 + $0xa0] sm:$0xff]  ;;  %v743_v19 = vld [vmem:[%s999_s2 + $0x98] sm:$0xff]  ;;  %v742_v23 = vld [vmem:[%s999_s2 + $0x90] sm:$0xff] }
   0x9   :  { %462 = vmatpush.bf16.msra.mxu3 %v746_v7  ;;  %v759_v24 = vld [vmem:[%s998_s3 + $0x8] sm:$0xff]  ;;  %v758_v28 = vld [vmem:[%s998_s3] sm:$0xff]  ;;  %v718_v33 = vld [vmem:[%s1000_s0 + $0xc] sm:$0xf0] }
   0xa   :  { %174 = vmatpush.bf16.msra.mxu0 %v763_v8  ;;  %v725_v25 = vld [vmem:[%s999_s2 + $0x8] sm:$0xff]  ;;  %v724_v29 = vld [vmem:[%s999_s2] sm:$0xff]  ;;  %v560_v35 = vld [vmem:[%s1000_s0 + $0x10] sm:$0xf0] }
   0xb   :  { %425 = vmatpush.bf16.msra.mxu1 %v729_v9  ;;  %v733_v26 = vld [vmem:[%s999_s2 + $0x48] sm:$0xff]  ;;  %v732_v30 = vld [vmem:[%s999_s2 + $0x40] sm:$0xff]  ;;  %v719_v37 = vld [vmem:[%s1000_s0 + $0x14] sm:$0xf0] }
   0xc   :  { %444 = vmatpush.bf16.msra.mxu2 %v737_v10  ;;  %v741_v27 = vld [vmem:[%s999_s2 + $0x88] sm:$0xff]  ;;  %v740_v31 = vld [vmem:[%s999_s2 + $0x80] sm:$0xff]  ;;  %v755_v38 = vld [vmem:[%s999_s2 + $0xf8] sm:$0xff] }
   0xd   :  { %463 = vmatpush.bf16.msra.mxu3 %v745_v11  ;;  %v558_v32 = vld [vmem:[%s1000_s0] sm:$0xf]  ;;  %v716_v34 = vld [vmem:[%s1000_s0 + $0x4] sm:$0xf]  ;;  %v566_v36 = vld [vmem:[%s1000_s0 + $0x8] sm:$0xf] }
   0xe   :  { %175 = vmatpush.bf16.msra.mxu0 %v762_v12  ;;  %v756_v39 = vld [vmem:[%s1001_s1] sm:$0xff]  ;;  %v559_v40 = vor.u32 %v718_v33, %v558_v32  ;;  %v563_v41 = vor.u32 %v716_v34, %v560_v35  ;;  %v567_v42 = vor.u32 %v719_v37, %v566_v36  ;;  %v754_v43 = vld [vmem:[%s999_s2 + $0xf0] sm:$0xff]  ;;  %v753_v44 = vld [vmem:[%s999_s2 + $0xe8] sm:$0xff] }
   0xf   :  { %426 = vmatpush.bf16.msra.mxu1 %v728_v13  ;;  %v752_v45 = vld [vmem:[%s999_s2 + $0xe0] sm:$0xff]  ;;  %v722_v47 = vld [vmem:[%s1000_s0 + $0x2c] sm:$0xf0]  ;;  %v576_v49 = vld [vmem:[%s1000_s0 + $0x30] sm:$0xf0] }
  0x10   :  { %445 = vmatpush.bf16.msra.mxu2 %v736_v14  ;;  %v574_v46 = vld [vmem:[%s1000_s0 + $0x20] sm:$0xf]  ;;  %v720_v48 = vld [vmem:[%s1000_s0 + $0x24] sm:$0xf]  ;;  %v582_v50 = vld [vmem:[%s1000_s0 + $0x28] sm:$0xf] }
  0x11   :  { %464 = vmatpush.bf16.msra.mxu3 %v744_v15  ;;  %v723_v51 = vld [vmem:[%s1000_s0 + $0x34] sm:$0xf0]  ;;  %v757_v53 = vld [vmem:[%s1001_s1 + $0x8] sm:$0xff]  ;;  %v575_v54 = vor.u32 %v722_v47, %v574_v46  ;;  %v579_v55 = vor.u32 %v720_v48, %v576_v49  ;;  %v750_v57 = vld [vmem:[%s999_s2 + $0xd0] sm:$0xff] }
  0x12   :  { %176 = vmatpush.bf16.msra.mxu0 %v761_v16  ;;  %v751_v52 = vld [vmem:[%s999_s2 + $0xd8] sm:$0xff]  ;;  %v583_v56 = vor.u32 %v723_v51, %v582_v50  ;;  %v749_v58 = vld [vmem:[%s999_s2 + $0xc8] sm:$0xff]  ;;  %v748_v59 = vld [vmem:[%s999_s2 + $0xc0] sm:$0xff] }
  0x13   :  { %427 = vmatpush.bf16.msra.mxu1 %v727_v17  ;;  %v717_v60 = vld [vmem:[%s1000_s0 + $0xc] sm:$0xf]  ;;  %v568_v61 = vld [vmem:[%s1000_s0 + $0x18] sm:$0xf0] }
  0x14   :  { %446 = vmatpush.bf16.msra.mxu2 %v735_v18  ;;  %v721_v62 = vld [vmem:[%s1000_s0 + $0x2c] sm:$0xf]  ;;  %v584_v63 = vld [vmem:[%s1000_s0 + $0x38] sm:$0xf0]  ;;  %v571_v0 = vor.u32 %v717_v60, %v568_v61 }
  0x15   :  { %465 = vmatpush.bf16.msra.mxu3 %v743_v19  ;;  %v587_v1 = vor.u32 %v721_v62, %v584_v63 }
  0x16   :  { %177 = vmatpush.bf16.msra.mxu0 %v760_v20 }
  0x17   :  { %428 = vmatpush.bf16.msra.mxu1 %v726_v21 }
  0x18   :  { %447 = vmatpush.bf16.msra.mxu2 %v734_v22 }
  0x19   :  { %466 = vmatpush.bf16.msra.mxu3 %v742_v23  ;;  %v774_v23 = vld [vmem:[%s1002_s4] ss:$0 sm:$0xff] }
  0x1a   :  { %178 = vmatpush.bf16.msra.mxu0 %v759_v24 }
  0x1b   :  { %429 = vmatpush.bf16.msra.mxu1 %v725_v25 }
  0x1c   :  { %448 = vmatpush.bf16.msra.mxu2 %v733_v26 }
  0x1d   :  { %467 = vmatpush.bf16.msra.mxu3 %v741_v27 }
  0x1e   :  { %179 = vmatpush.bf16.msra.mxu0 %v758_v28 }
  0x1f   :  { %430 = vmatpush.bf16.msra.mxu1 %v724_v29 }
  0x20   :  { %449 = vmatpush.bf16.msra.mxu2 %v732_v30 }
  0x21   :  { %468 = vmatpush.bf16.msra.mxu3 %v740_v31  ;;  %180 = vmatmul.bf16.vlgmr.msra.gmra.mxu0 %v756_v39 }
  0x22   :  { %480 = vmatpush.bf16.msrb.mxu0 %v755_v38  ;;  %431 = vmatmul.bf16.vlgmr.msra.gmra.mxu1 %v559_v40 }
  0x23   :  { %766 = vmatpush.bf16.msrb.mxu1 %v755_v38  ;;  %450 = vmatmul.bf16.vlgmr.msra.gmra.mxu2 %v563_v41 }
  0x24   :  { %469 = vmatmul.bf16.vlgmr.msra.gmra.mxu3 %v567_v42 }
  0x26   :  { %481 = vmatpush.bf16.msrb.mxu0 %v754_v43 }
  0x27   :  { %767 = vmatpush.bf16.msrb.mxu1 %v754_v43 }
  0x2a   :  { %482 = vmatpush.bf16.msrb.mxu0 %v753_v44 }
  0x2b   :  { %768 = vmatpush.bf16.msrb.mxu1 %v753_v44 }
  0x2e   :  { %483 = vmatpush.bf16.msrb.mxu0 %v752_v45 }
  0x2f   :  { %769 = vmatpush.bf16.msrb.mxu1 %v752_v45 }
  0x31   :  { %185 = vmatmul.bf16.gmra.mxu0 %v757_v53 }
  0x32   :  { %484 = vmatpush.bf16.msrb.mxu0 %v751_v52  ;;  %436 = vmatmul.bf16.gmra.mxu1 %v575_v54 }
  0x33   :  { %770 = vmatpush.bf16.msrb.mxu1 %v751_v52  ;;  %455 = vmatmul.bf16.gmra.mxu2 %v579_v55 }
  0x34   :  { %474 = vmatmul.bf16.gmra.mxu3 %v583_v56 }
  0x36   :  { %485 = vmatpush.bf16.msrb.mxu0 %v750_v57 }
  0x37   :  { %771 = vmatpush.bf16.msrb.mxu1 %v750_v57 }
  0x3a   :  { %486 = vmatpush.bf16.msrb.mxu0 %v749_v58 }
  0x3b   :  { %772 = vmatpush.bf16.msrb.mxu1 %v749_v58 }
  0x3e   :  { %487 = vmatpush.bf16.msrb.mxu0 %v748_v59 }
  0x3f   :  { %773 = vmatpush.bf16.msrb.mxu1 %v748_v59 }
  0x41   :  { %488 = vmatmul.bf16.vlgmr.msrb.gmra.mxu0 %v571_v0 }
  0x42   :  { %493 = vmatmul.bf16.vlgmr.msrb.gmra.mxu1 %v587_v1 }
  0x9e   :  { %v181_v2 = vpop.f32.mrf.mxu0 }
  0x9f   :  { %v432_v3 = vpop.f32.mrf.mxu1 }
  0xa0   :  { %v433_v15 = vadd.f32 %v432_v3, %v181_v2 }
  0xa6   :  { %v451_v4 = vpop.f32.mrf.mxu2  ;;  %v183_v6 = vpop.f32.mrf.mxu0 }
  0xa7   :  { %v470_v5 = vpop.f32.mrf.mxu3  ;;  %v434_v7 = vpop.f32.mrf.mxu1  ;;  %v452_v17 = vadd.f32 %v451_v4, %v433_v15 }
  0xa8   :  { %v435_v26 = vadd.f32 %v434_v7, %v183_v6 }
  0xa9   :  { %v471_v20 = vadd.f32 %v470_v5, %v452_v17 }
  0xae   :  { %v453_v8 = vpop.f32.mrf.mxu2  ;;  %v186_v9 = vpop.f32.mrf.mxu0 }
  0xaf   :  { %v437_v10 = vpop.f32.mrf.mxu1  ;;  %v472_v11 = vpop.f32.mrf.mxu3  ;;  %v454_v30 = vadd.f32 %v453_v8, %v435_v26 }
  0xb0   :  { %v438_v16 = vadd.f32 %v437_v10, %v186_v9 }
  0xb1   :  { %v473_v35 = vadd.f32 %v472_v11, %v454_v30 }
  0xb6   :  { %v456_v12 = vpop.f32.mrf.mxu2  ;;  %v188_v13 = vpop.f32.mrf.mxu0 }
  0xb7   :  { %v439_v14 = vpop.f32.mrf.mxu1  ;;  %v457_v18 = vadd.f32 %v456_v12, %v438_v16  ;;  %v475_v19 = vpop.f32.mrf.mxu3 }
  0xb8   :  { %v440_v27 = vadd.f32 %v439_v14, %v188_v13 }
  0xb9   :  { %v476_v21 = vadd.f32 %v475_v19, %v457_v18 }
  0xbe   :  { %v458_v22 = vpop.f32.mrf.mxu2  ;;  %v489_v24 = vpop.f32.mrf.mxu0 }
  0xbf   :  { %v494_v25 = vpop.f32.mrf.mxu1  ;;  %v490_v28 = vadd.f32 %v489_v24, %v471_v20  ;;  %v459_v31 = vadd.f32 %v458_v22, %v440_v27  ;;  %v477_v34 = vpop.f32.mrf.mxu3 }
  0xc0   :  { %v495_v29 = vadd.f32 %v494_v25, %v476_v21 }
  0xc1   :  { %v503_v32 = vadd.f32 %v774_v23, %v490_v28  ;;  %v478_v36 = vadd.f32 %v477_v34, %v459_v31 }
  0xc2   :  { %v505_v33 = vadd.f32 %v774_v23, %v495_v29 }
  0xc3   :  { %508 = vst.msk [vmem:[%s1003_s5] sm:$0xff] %vm507_vm0, %v503_v32 }
  0xc4   :  { %510 = vst.msk [vmem:[%s1003_s5 + $0x10] sm:$0xff] %vm507_vm0, %v505_v33 }
  0xc6   :  { %v491_v37 = vpop.f32.mrf.mxu0 }
  0xc7   :  { %v496_v38 = vpop.f32.mrf.mxu1  ;;  %v492_v39 = vadd.f32 %v491_v37, %v473_v35 }
  0xc8   :  { %v497_v40 = vadd.f32 %v496_v38, %v478_v36 }
  0xc9   :  { %v504_v41 = vadd.f32 %v774_v23, %v492_v39 }
  0xca   :  { %v506_v42 = vadd.f32 %v774_v23, %v497_v40 }
  0xcb   :  { %509 = vst.msk [vmem:[%s1003_s5 + $0x8] sm:$0xff] %vm507_vm0, %v504_v41 }
  0xcc   :  { %511 = vst.msk [vmem:[%s1003_s5 + $0x18] sm:$0xff] %vm507_vm0, %v506_v42 }

// kernel: forward.14
= control target key start
LH: loop header
LB: loop body
LE: loop exit
PB: predicated region body
PF: predicated region fallthrough
CT: control target
= control target key end

     0   :  { %s289_s9 = smov 0   ;;  %s309_s0 = inlined_call_operand.vmem [shape: f32[48,4], index: 0, kind: input, shape index: {}]   ;;  %s310_s1 = inlined_call_operand.vmem [shape: f32[4,16], index: 1, kind: input, shape index: {}]   ;;  %s311_s2 = inlined_call_operand.vmem [shape: f32[48,16], index: 2, kind: output, shape index: {}]  }
   0x1 LB: > { %s243_s10 = sadd.s32 4294967295, %s272_s9   ;;  %p247_p0 = scmp.ge.s32.totalorder %s272_s9, 1  ;;  %s272_s9 = sphi %s289_s9, %s12_s9  }
   0x2   : > { %p113_p1 = scmp.lt.s32.totalorder %s272_s9, 4 }
   0x4   : > { %p114_p2 = pnand %p247_p0, %p113_p1 }
   0x5   : > { %s248_s13 = sshll.u32 (!%p114_p2), %s243_s10, 1 }
   0x6   : > { %117 = sbr.rel (%p114_p2) target bundleno = 143 (0x8f), region = 28  ;;  %p136_p3 = scmp.lt.s32.totalorder (!%p114_p2), %s248_s13, 5 }
   0xb   : > { %v149_v0 = vld [vmem:[%s310_s1] sm:$0xf]  ;;  %vm157_vm0 = vcmask 1043456   ;;  %s313_s13 = smov (!%p136_p3, %s248_s13), 5  ;;  %vm150_vm1 = vcmask 31744   ;;  %vm184_vm2 = vcmask 130048  }
   0xc   : > { %252 = vmatpush.msk.msra.mxu0 %vm157_vm0, %v149_v0  ;;  %257 = vmatpush.msk.msra.mxu1 %vm157_vm0, %v149_v0  ;;  %s249_s14 = sshll.u32 %s313_s13, 3 }
   0xd   : > { %s139_s17 = scalar_lea.vmem %s309_s0, %s249_s14  ;;  %s145_s20 = scalar_lea.vmem %s311_s2, %s249_s14 }
   0xe   : > { %v147_v1 = vld [vmem:[%s139_s17] sm:$0xff]  ;;  %v148_v2 = vld [vmem:[%s139_s17 + $0x8] sm:$0xff] }
   0xf   : > { %253 = vmatmul.msk.f32.vlgmr.msra.gmra.mxu0 %vm150_vm1, %v147_v1  ;;  %254 = vmatmul.msk.f32.vlgmr.msra.gmra.mxu1 %vm150_vm1, %v148_v2 }
  0x8c   : > { %v178_v3 = vpop.f32.mrf.mxu0  ;;  %v181_v4 = vpop.f32.mrf.mxu1 }
  0x8d   : > { %185 = vst.msk [vmem:[%s145_s20] sm:$0xff] %vm184_vm2, %v178_v3 }
  0x8e   : > { %186 = vst.msk [vmem:[%s145_s20 + $0x8] sm:$0xff] %vm184_vm2, %v181_v4 }
  0x8f PF: > { %s12_s9 = sadd.s32 1, %s272_s9  }
  0x90   : > { %p9_p4 = scmp.ge.s32.totalorder %s12_s9, 5  }
  0x92   :  { %11 = sbr.rel (!%p9_p4) target bundleno = 1 (0x1), region = 58 }

// kernel: forward.15
= control target key start
LH: loop header
LB: loop body
LE: loop exit
PB: predicated region body
PF: predicated region fallthrough
CT: control target
= control target key end

     0   :  { %7 = vsyncpa [#allocation3], 0  ;;  %s570_s0 = inlined_call_operand.vmem [shape: f32[16,4], index: 0, kind: input, shape index: {}]   ;;  %s571_s1 = inlined_call_operand.vmem [shape: f32[12,4,16], index: 1, kind: input, shape index: {}]   ;;  %s572_s2 = inlined_call_operand.hbm [shape: f32[12,16,16], index: 2, kind: output, shape index: {}]  }
   0x1   :  { %9 = vsyncpa [#allocation3 + $0x1], 0  ;;  %s467_s9 = smov 0   ;;  %s469_s10 = smov 0  }
   0x2   :  { %s471_s11 = smov 0   ;;  %s473_s12 = smov 0  }
   0x3   :  { %s475_s13 = smov 0   ;;  %s477_s14 = smov 0  }
   0x4 LB: > { %s296_s15 = sadd.s32 4294967295, %s448_s14   ;;  %s297_s16 = sadd.s32 4294967294, %s448_s14   ;;  %s448_s14 = sphi %s477_s14, %s15_s14   ;;  %s444_s13 = sphi %s475_s13, %s579_s13   ;;  %s440_s12 = sphi %s473_s12, %s578_s12   ;;  %s436_s11 = sphi %s471_s11, %s577_s11   ;;  %s432_s10 = sphi %s469_s10, %s576_s10   ;;  %s428_s9 = sphi %s467_s9, %s575_s9  }
   0x5   : > { %s27_s17 = sadd.s32 1, %s444_s13  ;;  %s85_s18 = sadd.s32 1, %s436_s11 }
   0x6   : > { %p29_p0 = scmp.ge.s32.totalorder %s27_s17, 12  ;;  %p95_p1 = scmp.ne.s32.totalorder %s436_s11, %s432_s10 }
   0x7   : > { %p96_p2 = scmp.eq.s32.totalorder %s296_s15, 11  ;;  %p101_p3 = scmp.ne.s32.totalorder %s432_s10, %s428_s9 }
   0x8   : > { %s581_s17 = smov (%p29_p0, %s27_s17), 0  ;;  %p102_p5 = scmp.eq.s32.totalorder %s297_s16, 11 }
   0x9   : > { %p507_p4 = por %p96_p2, %p95_p1  ;;  %s80_s20 = ssub.s32 %s444_s13, %s581_s17 }
   0xa   : > { %p300_p6 = scmp.ge.s32.totalorder %s448_s14, 1  ;;  %p83_p7 = scmp.eq.s32.totalorder %s80_s20, 0 }
   0xb   : > { %p514_p8 = por %p102_p5, %p101_p3  ;;  %p133_p9 = scmp.lt.s32.totalorder %s448_s14, 13 }
   0xc   : > { %s520_s22 = scalar_select %p83_p7, %s436_s11, %s85_s18  }
   0xd   : > { %p134_p10 = pnand %p300_p6, %p133_p9 }
   0xe   : > { %p157_p11 = scmp.lt.s32.totalorder (!%p134_p10), %s440_s12, 11  ;;  %s154_s4 = sand.u32 (!%p134_p10), 1, %s432_s10  }
   0xf   : > { %137 = sbr.rel (%p134_p10) target bundleno = 157 (0x9d), region = 28  ;;  %s301_s5 = sshll.u32 (!%p134_p10), %s154_s4, 4 }
  0x10   : > { %s311_s6 = sshll.u32 (!%p134_p10), %s440_s12, 4  ;;  %s156_s16 = scalar_lea.vmem (!%p134_p10), [#allocation2], %s301_s5 }
  0x11   : > { %s217_s15 = scalar_lea.hbm (!%p134_p10), %s572_s2, %s311_s6  ;;  %s218_s18 = sshll.u32 (!%p134_p10), %s156_s16, 4  ;;  %s219_s18 = int_to_ptr.vmem [resolvable:$true] %s218_s18 }
  0x12   : > { %s220_s20 = sshll.u32 (!%p134_p10), %s217_s15, 4  ;;  %s221_s20 = int_to_ptr.hbm [resolvable:$true] %s220_s20 }
  0x14   : > { %s158_s23 = scalar_select %p157_p11, %s440_s12, 11  ;;  %vm174_vm0 = vcmask 1043456   ;;  %v164_v0 = vld [vmem:[%s570_s0] sm:$0xff]  ;;  %vm167_vm1 = vcmask 31744   ;;  %v165_v1 = vld [vmem:[%s570_s0 + $0x8] sm:$0xff]  ;;  %vm201_vm2 = vcmask 130048  }
  0x16   : > { %s302_s24 = sshll.u32 %s158_s23, 2  ;;  %s205_s23 = scalar_lea.sflag [#allocation3], %s154_s4 }
  0x17   : > { %s163_s27 = scalar_lea.vmem %s571_s1, %s302_s24  ;;  %s384_s24 = sshra.s32 %s221_s20, 4  ;;  %s385_s24 = int_to_ptr.hbm [resolvable:$true] %s384_s24 }
  0x18   : > { %v166_v2 = vld [vmem:[%s163_s27] sm:$0xf]  ;;  %s386_s25 = scalar_lea.hbm %s385_s24, 16  ;;  %s390_s27 = scalar_lea.hbm %s572_s2, 192 }
  0x19   : > { %303 = vmatpush.msk.msra.mxu0 %vm174_vm0, %v166_v2  ;;  %312 = vmatpush.msk.msra.mxu1 %vm174_vm0, %v166_v2  ;;  %p387_p12 = scmp.ne.s32.totalorder %s385_s24, %s386_s25  ;;  %p391_p1 = scmp.lt.s32.totalorder %s385_s24, %s572_s2 }
  0x1a   : > { %304 = vmatmul.msk.f32.vlgmr.msra.gmra.mxu0 %vm167_vm1, %v164_v0  ;;  %305 = vmatmul.msk.f32.vlgmr.msra.gmra.mxu1 %vm167_vm1, %v165_v1  ;;  %p392_p2 = scmp.lt.s32.totalorder %s390_s27, %s386_s25 }
  0x1b   : > { %p388_p13 = pnand %p387_p12, %p507_p4 }
  0x1c   : > { %p393_p3 = por %p392_p2, %p391_p1 }
  0x1d   : > { %p389_p0 = pneg %p388_p13 }
  0x1f   : > { %p394_p5 = pnand %p393_p3, %p389_p0 }
  0x97   : > { %v195_v3 = vpop.f32.mrf.mxu0  ;;  %v198_v4 = vpop.f32.mrf.mxu1 }
  0x98   : > { %202 = vst.msk [vmem:[%s156_s16] sm:$0xff] %vm201_vm2, %v195_v3 }
  0x99   : > { %203 = vst.msk [vmem:[%s156_s16 + $0x8] sm:$0xff] %vm201_vm2, %v198_v4 }
  0x9a   : > { %397 = shalt.err (!%p394_p5)
}
  0x9b   : > { %s450_s30 = smov 128   ;;  %s451_s3 = smov 8  }
  0x9c   : > { %313 = dma.vmem_to_hbm [thread:$0]  (%p507_p4), %s219_s18, 256, %s221_s20, %s205_s23, %s450_s30, %s450_s30, %s451_s3  }
  0x9d PF: > { %p319_p6 = scmp.ge.s32.totalorder %s448_s14, 2  ;;  %s235_s4 = sand.u32 1, %s428_s9  }
  0x9e   : > { %s236_s5 = scalar_lea.sflag [#allocation3], %s235_s4 }
  0x9f   : > { %p316_p7 = pnand %p319_p6, %p514_p8 }
  0xa1   : > { %p317_p9 = pneg %p316_p7 }
  0xa3   : > { %423 = dma.done.wait (%p317_p9), %s236_s5, 256  }
  0xa4   : > { %425 = vsyncadd (%p317_p9), %s236_s5, 4294967040  ;;  %s15_s14 = sadd.s32 1, %s448_s14   ;;  %s575_s9 = smov %s432_s10 }
  0xa5   : > { %p12_p10 = scmp.ge.s32.totalorder %s15_s14, 14   ;;  %s576_s10 = smov %s436_s11 }
  0xa6   : > { %s577_s11 = smov %s520_s22  ;;  %s578_s12 = smov %s444_s13 }
  0xa7   : > { %s579_s13 = smov %s581_s17  ;;  %14 = sbr.rel (!%p12_p10) target bundleno = 4 (0x4), region = 63 }
  0xac   :  { %242 = vsyncpa [#allocation3], 1 }
  0xad   :  { %244 = vsyncpa [#allocation3 + $0x1], 1 }

</bundles_post_ra>
